<compile_context>
chip_gen: v6e
topology: v6e:2x2x1
jax: 0.10.0
libtpu: 0.0.40
codegen_flags: <defaults>
</compile_context>

<pallas_src>
import functools

import numpy as np
import jax
import jax.numpy as jnp
from jax import lax
from jax.experimental import pallas as pl
from jax.experimental.pallas import tpu as pltpu


# --------------------------------------------------------------------------- #
# In-kernel helpers
# --------------------------------------------------------------------------- #
def _selector_mats(C, NL):
    """0/1 matrices for lane-group<->channel folds (built from iota, stay lane-dense).

    sel   : (NL, C)  sel[l, c]   = 1  iff  l % C == c   (reduce lanes -> channels, MXU)
    bcast : (C, NL)  bcast[c, l] = 1  iff  l % C == c   (broadcast channels -> lanes, MXU)
    """
    lane = lax.broadcasted_iota(jnp.int32, (NL, C), 0)
    ch = lax.broadcasted_iota(jnp.int32, (NL, C), 1)
    sel = (lane % C == ch).astype(jnp.float32)
    ch2 = lax.broadcasted_iota(jnp.int32, (C, NL), 0)
    lane2 = lax.broadcasted_iota(jnp.int32, (C, NL), 1)
    bcast = (lane2 % C == ch2).astype(jnp.float32)
    return sel, bcast


def _bn_lrelu(y, gamma, beta, sel, bcast, cnt, eps, slope):
    """Fused batch-stat BatchNorm + LeakyReLU on an (M, NL) f32 conv output.

    Two-pass variance (mean first, then centered sum of squares) for numerical safety.
    Lane<->channel folds are tiny 0/1 selector matmuls, so data never changes layout.
    """
    inv = 1.0 / cnt
    colsum = jnp.sum(y, axis=0, keepdims=True)                                  # (1, NL)
    ch_mean = jnp.dot(colsum, sel, preferred_element_type=jnp.float32) * inv    # (1, C)
    mean_nl = jnp.dot(ch_mean, bcast, preferred_element_type=jnp.float32)       # (1, NL)
    d = y - mean_nl
    ch_var = jnp.dot(jnp.sum(d * d, axis=0, keepdims=True), sel,
                     preferred_element_type=jnp.float32) * inv                  # (1, C)
    scale_c = gamma * lax.rsqrt(ch_var + eps)                                   # (1, C)
    scale_nl = jnp.dot(scale_c, bcast, preferred_element_type=jnp.float32)      # (1, NL)
    beta_nl = jnp.dot(beta, bcast, preferred_element_type=jnp.float32)          # (1, NL)
    z = d * scale_nl + beta_nl
    return jnp.where(z > 0, z, slope * z)


def _down_block_kernel(*refs, N, Ho, Wo, Cout, Cmid, num_blocks, eps, slope, cdt):
    """Whole downBlock forward; every ref is a full (tiny) array resident in VMEM.

    refs = [x_im2col, S_up, S_dn, band0, g0, b0]
           + per block [band1, g1, b1, band2(3 taps), g2, b2, band3, g3, b3]
           + [out]
    """
    it = iter(refs)
    x_ref, sup_ref, sdn_ref = next(it), next(it), next(it)
    band0_ref, g0_ref, be0_ref = next(it), next(it), next(it)
    blocks = [tuple(next(it) for _ in range(9)) for _ in range(num_blocks)]
    o_ref = next(it)

    NL, NLm = Wo * Cout, Wo * Cmid
    cnt = float(N * Ho * Wo)
    sel_o, bc_o = _selector_mats(Cout, NL)
    sel_m, bc_m = _selector_mats(Cmid, NLm)
    sup, sdn = sup_ref[...], sdn_ref[...]

    def mm(lhs, rhs):                 # MXU matmul: operands in cdt, accumulate in f32
        return jnp.dot(lhs.astype(cdt), rhs, preferred_element_type=jnp.float32)

    # down1: stride-2 KxK conv == one matmul (kh folded by the wrapper im2col, kw/stride/
    # pad folded into the band weights), fused with BN + LeakyReLU.
    a = mm(x_ref[...], band0_ref[...])                                          # (M, NL)
    a = _bn_lrelu(a, g0_ref[...], be0_ref[...], sel_o, bc_o, cnt, eps, slope)

    for (w1, g1, b1, w2, g2, b2, w3, g3, b3) in blocks:                         # unrolled
        res = a
        # conv1: 1x1
        h = mm(a, w1[...])                                                      # (M, NLm)
        h = _bn_lrelu(h, g1[...], b1[...], sel_m, bc_m, cnt, eps, slope)
        # conv2: 3x3 / stride 1 / pad 1.  H-halo rows (and zero rows at batch boundaries)
        # come from tiny 0/1 row-shift matmuls; kw taps + W padding are in the band.
        up = jnp.dot(sup, h, preferred_element_type=jnp.float32)                # row h-1
        dn = jnp.dot(sdn, h, preferred_element_type=jnp.float32)                # row h+1
        y2 = mm(up, w2[0]) + mm(h, w2[1]) + mm(dn, w2[2])
        y2 = _bn_lrelu(y2, g2[...], b2[...], sel_m, bc_m, cnt, eps, slope)
        # conv3: 1x1, then the ShortcutBlock residual add (fully fused).
        y3 = mm(y2, w3[...])                                                    # (M, NL)
        a = _bn_lrelu(y3, g3[...], b3[...], sel_o, bc_o, cnt, eps, slope) + res

    o_ref[...] = a


# --------------------------------------------------------------------------- #
# Wrapper-side weight preparation (weight-sized work, built once per call)
# --------------------------------------------------------------------------- #
def _band_weights(w_oihw, W_in, W_out, stride, pad):
    """A[kh, wi*Cin+ci, wo*Cout+co] = w[co,ci,kh,kw]  iff  wi == wo*stride + kw - pad.

    Folds the kw taps, stride and W-boundary padding into one dense band matrix per kh
    so each conv is a lane-dense matmul on the (N*H, W*C) row-matrix layout.
    """
    Cout, Cin, KH, KW = w_oihw.shape
    M = np.zeros((KW, W_out, W_in), np.float32)
    for kw in range(KW):
        for wo in range(W_out):
            wi = wo * stride + kw - pad
            if 0 <= wi < W_in:
                M[kw, wo, wi] = 1.0
    w_hwio = jnp.transpose(w_oihw, (2, 3, 1, 0))                   # (KH, KW, Cin, Cout)
    band = jnp.einsum("xov,hxic->hvioc", jnp.asarray(M), w_hwio)   # (KH, Win, Cin, Wout, Cout)
    return band.reshape(KH, W_in * Cin, W_out * Cout)


def _row_shift_mats(N, Ho):
    """(M, M) 0/1 matrices selecting the row above / below, zero across image & batch edges."""
    M = N * Ho
    up = np.zeros((M, M), np.float32)
    dn = np.zeros((M, M), np.float32)
    for r in range(M):
        if r % Ho != 0:
            up[r, r - 1] = 1.0
        if r % Ho != Ho - 1:
            dn[r, r + 1] = 1.0
    return jnp.asarray(up), jnp.asarray(dn)


# --------------------------------------------------------------------------- #
# downBlock forward (single fused pallas_call)
# --------------------------------------------------------------------------- #
def down_block_forward(x_nchw, params, *, ksize, stride, pad, num_blocks,
                       matmul_dtype=jnp.bfloat16, eps=1e-5, slope=0.1):
    N, Cin, H, W = x_nchw.shape
    Cout = params["down1"]["w"].shape[0]
    Cmid = Cout // 2
    Ho = (H + 2 * pad - ksize) // stride + 1
    Wo = (W + 2 * pad - ksize) // stride + 1
    NL, NLm, M = Wo * Cout, Wo * Cmid, N * Ho

    # Single layout change in / out: NCHW -> (N, H, W*C) row matrices (W, C lane-folded).
    x3 = jnp.transpose(x_nchw, (0, 2, 3, 1)).reshape(N, H, W * Cin)

    # down1 row-im2col: folds kh (and the H-halo of the strided conv) into the contraction
    # on the tiny network input, wrapper side, so the kernel sees a single matmul.
    xp = jnp.pad(x3, ((0, 0), (pad, pad), (0, 0)))
    cols = [xp[:, kh: kh + (Ho - 1) * stride + 1: stride, :] for kh in range(ksize)]
    xin = jnp.concatenate(cols, axis=-1).reshape(M, ksize * W * Cin).astype(matmul_dtype)

    def row(v):
        return jnp.asarray(v, jnp.float32).reshape(1, -1)

    band0 = _band_weights(params["down1"]["w"], W, Wo, stride, pad)
    band0 = band0.reshape(ksize * W * Cin, NL).astype(matmul_dtype)
    sup, sdn = _row_shift_mats(N, Ho)

    args = [xin, sup, sdn, band0,
            row(params["down1"]["gamma"]), row(params["down1"]["beta"])]
    for blk in params["blocks"][:num_blocks]:
        b1 = _band_weights(blk["w1"], Wo, Wo, 1, 0).reshape(NL, NLm).astype(matmul_dtype)
        b2 = _band_weights(blk["w2"], Wo, Wo, 1, 1).astype(matmul_dtype)       # (3, NLm, NLm)
        b3 = _band_weights(blk["w3"], Wo, Wo, 1, 0).reshape(NLm, NL).astype(matmul_dtype)
        args += [b1, row(blk["g1"]), row(blk["b1"]),
                 b2, row(blk["g2"]), row(blk["b2"]),
                 b3, row(blk["g3"]), row(blk["b3"])]

    kernel = functools.partial(_down_block_kernel, N=N, Ho=Ho, Wo=Wo, Cout=Cout,
                               Cmid=Cmid, num_blocks=num_blocks, eps=eps, slope=slope,
                               cdt=matmul_dtype)

    # Explicit scoped-VMEM limit sized from the actual resident data (review: v5e default
    # is only 16 MiB; everything here is KB-scale but keep generous headroom).
    in_bytes = sum(int(np.prod(a.shape)) * a.dtype.itemsize for a in args) + M * NL * 4
    vmem_limit = int(min(max(8 * in_bytes + (2 << 20), 4 << 20), 48 << 20))

    out = pl.pallas_call(
        kernel,
        out_shape=jax.ShapeDtypeStruct((M, NL), jnp.float32),
        in_specs=[pl.BlockSpec(memory_space=pltpu.MemorySpace.VMEM) for _ in args],
        out_specs=pl.BlockSpec(memory_space=pltpu.MemorySpace.VMEM),
        compiler_params=pltpu.CompilerParams(vmem_limit_bytes=vmem_limit),
    )(*args)

    return jnp.transpose(out.reshape(N, Ho, Wo, Cout), (0, 3, 1, 2))


# --------------------------------------------------------------------------- #
# Pure-JAX reference (same semantics: training-mode BN with batch statistics) + params
# --------------------------------------------------------------------------- #
def _ref_conv_bn_lrelu(x, w, gamma, beta, stride, pad, eps=1e-5, slope=0.1):
    y = lax.conv_general_dilated(x, w, (stride, stride), ((pad, pad), (pad, pad)),
                                 dimension_numbers=("NCHW", "OIHW", "NCHW"))
    mean = jnp.mean(y, axis=(0, 2, 3), keepdims=True)
    var = jnp.mean((y - mean) ** 2, axis=(0, 2, 3), keepdims=True)
    z = (y - mean) * lax.rsqrt(var + eps) * gamma.reshape(1, -1, 1, 1) + beta.reshape(1, -1, 1, 1)
    return jnp.where(z > 0, z, slope * z)


def _ref_down_block(x, params, ksize, stride, pad, num_blocks):
    d = params["down1"]
    z = _ref_conv_bn_lrelu(x, d["w"], d["gamma"], d["beta"], stride, pad)
    for i in range(num_blocks):
        blk = params["blocks"][i]
        r = z
        y = _ref_conv_bn_lrelu(z, blk["w1"], blk["g1"], blk["b1"], 1, 0)
        y = _ref_conv_bn_lrelu(y, blk["w2"], blk["g2"], blk["b2"], 1, 1)
        y = _ref_conv_bn_lrelu(y, blk["w3"], blk["g3"], blk["b3"], 1, 0)
        z = y + r
    return z


def _init_params(key, in_c, out_c, ksize, num_blocks):
    def conv_w(k, co, ci, kh, kw):
        return jax.random.normal(k, (co, ci, kh, kw), jnp.float32) / np.sqrt(ci * kh * kw)

    def bn(k, c):
        k1, k2 = jax.random.split(k)
        return (1.0 + 0.1 * jax.random.normal(k1, (c,), jnp.float32),
                0.1 * jax.random.normal(k2, (c,), jnp.float32))

    kit = iter(jax.random.split(key, 2 + 6 * num_blocks))
    g, b = bn(next(kit), out_c)
    params = {"down1": {"w": conv_w(next(kit), out_c, in_c, ksize, ksize),
                        "gamma": g, "beta": b},
              "blocks": []}
    mid = out_c // 2
    for _ in range(num_blocks):
        g1, b1 = bn(next(kit), mid)
        g2, b2 = bn(next(kit), mid)
        g3, b3 = bn(next(kit), out_c)
        params["blocks"].append({
            "w1": conv_w(next(kit), mid, out_c, 1, 1), "g1": g1, "b1": b1,
            "w2": conv_w(next(kit), mid, mid, 3, 3), "g2": g2, "b2": b2,
            "w3": conv_w(next(kit), out_c, mid, 1, 1), "g3": g3, "b3": b3,
        })
    return params


# --------------------------------------------------------------------------- #
# Main
# --------------------------------------------------------------------------- #
if __name__ == "__main__":
    # downBlock(in_channels=4, out_channels=8, kernel_size=3, stride=2, padding=1, num_blocks=2)
    N, Cin, H, W = 2, 4, 16, 16
    Cout, ksize, stride, pad, num_blocks = 8, 3, 2, 1, 2

    key = jax.random.PRNGKey(0)
    kx, kp = jax.random.split(key)
    x = jax.random.normal(kx, (N, Cin, H, W), jnp.float32)
    params = _init_params(kp, Cin, Cout, ksize, num_blocks)

    ref = _ref_down_block(x, params, ksize, stride, pad, num_blocks)
    Ho = (H + 2 * pad - ksize) // stride + 1

    # f32 matmul operands: faithful to the module's f32 semantics (tight check).
    fwd32 = jax.jit(functools.partial(down_block_forward, ksize=ksize, stride=stride,
                                      pad=pad, num_blocks=num_blocks,
                                      matmul_dtype=jnp.float32))
    out32 = jax.block_until_ready(fwd32(x, params))
    assert out32.shape == (N, Cout, Ho, Ho), out32.shape
    err32 = float(jnp.max(jnp.abs(out32 - ref)))
    assert err32 < 2e-3, err32

    # bf16 matmul operands with f32 accumulation / stats / elementwise: the MXU fast path
    # recommended by the review for v5e/v6e/v7x; checked loosely vs. the f32 reference.
    fwd16 = jax.jit(functools.partial(down_block_forward, ksize=ksize, stride=stride,
                                      pad=pad, num_blocks=num_blocks,
                                      matmul_dtype=jnp.bfloat16))
    out16 = jax.block_until_ready(fwd16(x, params))
    err16 = float(jnp.max(jnp.abs(out16 - ref)))
    ref_max = float(jnp.max(jnp.abs(ref)))
    assert err16 < 0.1 * ref_max + 1e-3, (err16, ref_max)

    print("KERNEL_OK")
</pallas_src>

<mosaic_0001>
module attributes {stable_mosaic.version = 11 : i64} {
  func.func @_down_block_kernel(%arg0: memref<16x192xf32, #tpu.memory_space<vmem>>, %arg1: memref<16x16xf32, #tpu.memory_space<vmem>>, %arg2: memref<16x16xf32, #tpu.memory_space<vmem>>, %arg3: memref<192x64xf32, #tpu.memory_space<vmem>>, %arg4: memref<1x8xf32, #tpu.memory_space<vmem>>, %arg5: memref<1x8xf32, #tpu.memory_space<vmem>>, %arg6: memref<64x32xf32, #tpu.memory_space<vmem>>, %arg7: memref<1x4xf32, #tpu.memory_space<vmem>>, %arg8: memref<1x4xf32, #tpu.memory_space<vmem>>, %arg9: memref<3x32x32xf32, #tpu.memory_space<vmem>>, %arg10: memref<1x4xf32, #tpu.memory_space<vmem>>, %arg11: memref<1x4xf32, #tpu.memory_space<vmem>>, %arg12: memref<32x64xf32, #tpu.memory_space<vmem>>, %arg13: memref<1x8xf32, #tpu.memory_space<vmem>>, %arg14: memref<1x8xf32, #tpu.memory_space<vmem>>, %arg15: memref<64x32xf32, #tpu.memory_space<vmem>>, %arg16: memref<1x4xf32, #tpu.memory_space<vmem>>, %arg17: memref<1x4xf32, #tpu.memory_space<vmem>>, %arg18: memref<3x32x32xf32, #tpu.memory_space<vmem>>, %arg19: memref<1x4xf32, #tpu.memory_space<vmem>>, %arg20: memref<1x4xf32, #tpu.memory_space<vmem>>, %arg21: memref<32x64xf32, #tpu.memory_space<vmem>>, %arg22: memref<1x8xf32, #tpu.memory_space<vmem>>, %arg23: memref<1x8xf32, #tpu.memory_space<vmem>>, %arg24: memref<16x64xf32, #tpu.memory_space<vmem>>) attributes {dimension_semantics = [], scalar_prefetch = 0 : i64, scratch_operands = 0 : i64, tpu.core_type = #tpu.core_type<tc>} {
    %0 = tpu.iota {dimensions = array<i32: 0>} : vector<64x8xi32>
    %1 = tpu.iota {dimensions = array<i32: 1>} : vector<64x8xi32>
    %c8_i32 = arith.constant 8 : i32
    %c0_i32 = arith.constant 0 : i32
    %2 = arith.cmpi eq, %c8_i32, %c0_i32 : i32
    %c1_i32 = arith.constant 1 : i32
    %3 = arith.select %2, %c1_i32, %c8_i32 : i32
    %4 = vector.broadcast %3 : i32 to vector<64x8xi32>
    %5 = arith.remsi %0, %4 : vector<64x8xi32>
    %c0_i32_0 = arith.constant 0 : i32
    %6 = vector.broadcast %c0_i32_0 : i32 to vector<64x8xi32>
    %7 = arith.cmpi ne, %5, %6 : vector<64x8xi32>
    %c0_i32_1 = arith.constant 0 : i32
    %8 = vector.broadcast %c0_i32_1 : i32 to vector<64x8xi32>
    %9 = arith.cmpi slt, %5, %8 : vector<64x8xi32>
    %c0_i32_2 = arith.constant 0 : i32
    %10 = arith.cmpi slt, %3, %c0_i32_2 : i32
    %11 = vector.broadcast %10 : i1 to vector<64x8xi1>
    %12 = vector.broadcast %11 : vector<64x8xi1> to vector<64x8xi1>
    %13 = arith.xori %9, %12 : vector<64x8xi1>
    %14 = arith.andi %13, %7 : vector<64x8xi1>
    %15 = vector.broadcast %3 : i32 to vector<64x8xi32>
    %16 = arith.addi %5, %15 : vector<64x8xi32>
    %17 = arith.select %14, %16, %5 : vector<64x8xi1>, vector<64x8xi32>
    %18 = arith.cmpi eq, %17, %1 : vector<64x8xi32>
    %19 = arith.extui %18 : vector<64x8xi1> to vector<64x8xi32>
    %20 = arith.sitofp %19 : vector<64x8xi32> to vector<64x8xf32>
    %21 = tpu.iota {dimensions = array<i32: 0>} : vector<8x64xi32>
    %22 = tpu.iota {dimensions = array<i32: 1>} : vector<8x64xi32>
    %c8_i32_3 = arith.constant 8 : i32
    %c0_i32_4 = arith.constant 0 : i32
    %23 = arith.cmpi eq, %c8_i32_3, %c0_i32_4 : i32
    %c1_i32_5 = arith.constant 1 : i32
    %24 = arith.select %23, %c1_i32_5, %c8_i32_3 : i32
    %25 = vector.broadcast %24 : i32 to vector<8x64xi32>
    %26 = arith.remsi %22, %25 : vector<8x64xi32>
    %c0_i32_6 = arith.constant 0 : i32
    %27 = vector.broadcast %c0_i32_6 : i32 to vector<8x64xi32>
    %28 = arith.cmpi ne, %26, %27 : vector<8x64xi32>
    %c0_i32_7 = arith.constant 0 : i32
    %29 = vector.broadcast %c0_i32_7 : i32 to vector<8x64xi32>
    %30 = arith.cmpi slt, %26, %29 : vector<8x64xi32>
    %c0_i32_8 = arith.constant 0 : i32
    %31 = arith.cmpi slt, %24, %c0_i32_8 : i32
    %32 = vector.broadcast %31 : i1 to vector<8x64xi1>
    %33 = vector.broadcast %32 : vector<8x64xi1> to vector<8x64xi1>
    %34 = arith.xori %30, %33 : vector<8x64xi1>
    %35 = arith.andi %34, %28 : vector<8x64xi1>
    %36 = vector.broadcast %24 : i32 to vector<8x64xi32>
    %37 = arith.addi %26, %36 : vector<8x64xi32>
    %38 = arith.select %35, %37, %26 : vector<8x64xi1>, vector<8x64xi32>
    %39 = arith.cmpi eq, %38, %21 : vector<8x64xi32>
    %40 = arith.extui %39 : vector<8x64xi1> to vector<8x64xi32>
    %41 = arith.sitofp %40 : vector<8x64xi32> to vector<8x64xf32>
    %42 = tpu.iota {dimensions = array<i32: 0>} : vector<32x4xi32>
    %43 = tpu.iota {dimensions = array<i32: 1>} : vector<32x4xi32>
    %c4_i32 = arith.constant 4 : i32
    %c0_i32_9 = arith.constant 0 : i32
    %44 = arith.cmpi eq, %c4_i32, %c0_i32_9 : i32
    %c1_i32_10 = arith.constant 1 : i32
    %45 = arith.select %44, %c1_i32_10, %c4_i32 : i32
    %46 = vector.broadcast %45 : i32 to vector<32x4xi32>
    %47 = arith.remsi %42, %46 : vector<32x4xi32>
    %c0_i32_11 = arith.constant 0 : i32
    %48 = vector.broadcast %c0_i32_11 : i32 to vector<32x4xi32>
    %49 = arith.cmpi ne, %47, %48 : vector<32x4xi32>
    %c0_i32_12 = arith.constant 0 : i32
    %50 = vector.broadcast %c0_i32_12 : i32 to vector<32x4xi32>
    %51 = arith.cmpi slt, %47, %50 : vector<32x4xi32>
    %c0_i32_13 = arith.constant 0 : i32
    %52 = arith.cmpi slt, %45, %c0_i32_13 : i32
    %53 = vector.broadcast %52 : i1 to vector<32x4xi1>
    %54 = vector.broadcast %53 : vector<32x4xi1> to vector<32x4xi1>
    %55 = arith.xori %51, %54 : vector<32x4xi1>
    %56 = arith.andi %55, %49 : vector<32x4xi1>
    %57 = vector.broadcast %45 : i32 to vector<32x4xi32>
    %58 = arith.addi %47, %57 : vector<32x4xi32>
    %59 = arith.select %56, %58, %47 : vector<32x4xi1>, vector<32x4xi32>
    %60 = arith.cmpi eq, %59, %43 : vector<32x4xi32>
    %61 = arith.extui %60 : vector<32x4xi1> to vector<32x4xi32>
    %62 = arith.sitofp %61 : vector<32x4xi32> to vector<32x4xf32>
    %63 = tpu.iota {dimensions = array<i32: 0>} : vector<4x32xi32>
    %64 = tpu.iota {dimensions = array<i32: 1>} : vector<4x32xi32>
    %c4_i32_14 = arith.constant 4 : i32
    %c0_i32_15 = arith.constant 0 : i32
    %65 = arith.cmpi eq, %c4_i32_14, %c0_i32_15 : i32
    %c1_i32_16 = arith.constant 1 : i32
    %66 = arith.select %65, %c1_i32_16, %c4_i32_14 : i32
    %67 = vector.broadcast %66 : i32 to vector<4x32xi32>
    %68 = arith.remsi %64, %67 : vector<4x32xi32>
    %c0_i32_17 = arith.constant 0 : i32
    %69 = vector.broadcast %c0_i32_17 : i32 to vector<4x32xi32>
    %70 = arith.cmpi ne, %68, %69 : vector<4x32xi32>
    %c0_i32_18 = arith.constant 0 : i32
    %71 = vector.broadcast %c0_i32_18 : i32 to vector<4x32xi32>
    %72 = arith.cmpi slt, %68, %71 : vector<4x32xi32>
    %c0_i32_19 = arith.constant 0 : i32
    %73 = arith.cmpi slt, %66, %c0_i32_19 : i32
    %74 = vector.broadcast %73 : i1 to vector<4x32xi1>
    %75 = vector.broadcast %74 : vector<4x32xi1> to vector<4x32xi1>
    %76 = arith.xori %72, %75 : vector<4x32xi1>
    %77 = arith.andi %76, %70 : vector<4x32xi1>
    %78 = vector.broadcast %66 : i32 to vector<4x32xi32>
    %79 = arith.addi %68, %78 : vector<4x32xi32>
    %80 = arith.select %77, %79, %68 : vector<4x32xi1>, vector<4x32xi32>
    %81 = arith.cmpi eq, %80, %63 : vector<4x32xi32>
    %82 = arith.extui %81 : vector<4x32xi1> to vector<4x32xi32>
    %83 = arith.sitofp %82 : vector<4x32xi32> to vector<4x32xf32>
    %c0 = arith.constant 0 : index
    %c0_20 = arith.constant 0 : index
    %84 = vector.load %arg1[%c0, %c0_20] : memref<16x16xf32, #tpu.memory_space<vmem>>, vector<16x16xf32>
    %c0_21 = arith.constant 0 : index
    %c0_22 = arith.constant 0 : index
    %85 = vector.load %arg2[%c0_21, %c0_22] : memref<16x16xf32, #tpu.memory_space<vmem>>, vector<16x16xf32>
    %c0_23 = arith.constant 0 : index
    %c0_24 = arith.constant 0 : index
    %86 = vector.load %arg0[%c0_23, %c0_24] : memref<16x192xf32, #tpu.memory_space<vmem>>, vector<16x192xf32>
    %c0_25 = arith.constant 0 : index
    %c0_26 = arith.constant 0 : index
    %87 = vector.load %arg3[%c0_25, %c0_26] : memref<192x64xf32, #tpu.memory_space<vmem>>, vector<192x64xf32>
    %cst = arith.constant dense<0.000000e+00> : vector<16x64xf32>
    %88 = tpu.matmul %86, %87, %cst {dimension_numbers = #tpu.dot_dimension_numbers<[1], [0], [0], [1], [0, 0, 1, 1], [], []>} : vector<16x192xf32>, vector<192x64xf32>, vector<16x64xf32> -> vector<16x64xf32>
    %c0_27 = arith.constant 0 : index
    %c0_28 = arith.constant 0 : index
    %89 = vector.load %arg4[%c0_27, %c0_28] : memref<1x8xf32, #tpu.memory_space<vmem>>, vector<1x8xf32>
    %c0_29 = arith.constant 0 : index
    %c0_30 = arith.constant 0 : index
    %90 = vector.load %arg5[%c0_29, %c0_30] : memref<1x8xf32, #tpu.memory_space<vmem>>, vector<1x8xf32>
    %cst_31 = arith.constant dense<0.000000e+00> : vector<64xf32>
    %91 = vector.multi_reduction <add>, %88, %cst_31 [0] : vector<16x64xf32> to vector<64xf32>
    %92 = vector.shape_cast %91 : vector<64xf32> to vector<1x64xf32>
    %cst_32 = arith.constant dense<0.000000e+00> : vector<1x8xf32>
    %93 = tpu.matmul %92, %20, %cst_32 {dimension_numbers = #tpu.dot_dimension_numbers<[1], [0], [0], [1], [0, 0, 1, 1], [], []>} : vector<1x64xf32>, vector<64x8xf32>, vector<1x8xf32> -> vector<1x8xf32>
    %cst_33 = arith.constant 7.812500e-03 : f32
    %94 = vector.broadcast %cst_33 : f32 to vector<1x8xf32>
    %95 = arith.mulf %93, %94 : vector<1x8xf32>
    %cst_34 = arith.constant dense<0.000000e+00> : vector<1x64xf32>
    %96 = tpu.matmul %95, %41, %cst_34 {dimension_numbers = #tpu.dot_dimension_numbers<[1], [0], [0], [1], [0, 0, 1, 1], [], []>} : vector<1x8xf32>, vector<8x64xf32>, vector<1x64xf32> -> vector<1x64xf32>
    %97 = vector.broadcast %96 : vector<1x64xf32> to vector<16x64xf32>
    %98 = arith.subf %88, %97 : vector<16x64xf32>
    %99 = arith.mulf %98, %98 : vector<16x64xf32>
    %cst_35 = arith.constant dense<0.000000e+00> : vector<64xf32>
    %100 = vector.multi_reduction <add>, %99, %cst_35 [0] : vector<16x64xf32> to vector<64xf32>
    %101 = vector.shape_cast %100 : vector<64xf32> to vector<1x64xf32>
    %cst_36 = arith.constant dense<0.000000e+00> : vector<1x8xf32>
    %102 = tpu.matmul %101, %20, %cst_36 {dimension_numbers = #tpu.dot_dimension_numbers<[1], [0], [0], [1], [0, 0, 1, 1], [], []>} : vector<1x64xf32>, vector<64x8xf32>, vector<1x8xf32> -> vector<1x8xf32>
    %cst_37 = arith.constant 7.812500e-03 : f32
    %103 = vector.broadcast %cst_37 : f32 to vector<1x8xf32>
    %104 = arith.mulf %102, %103 : vector<1x8xf32>
    %cst_38 = arith.constant 9.99999974E-6 : f32
    %105 = vector.broadcast %cst_38 : f32 to vector<1x8xf32>
    %106 = arith.addf %104, %105 : vector<1x8xf32>
    %107 = math.rsqrt %106 : vector<1x8xf32>
    %108 = arith.mulf %89, %107 : vector<1x8xf32>
    %cst_39 = arith.constant dense<0.000000e+00> : vector<1x64xf32>
    %109 = tpu.matmul %108, %41, %cst_39 {dimension_numbers = #tpu.dot_dimension_numbers<[1], [0], [0], [1], [0, 0, 1, 1], [], []>} : vector<1x8xf32>, vector<8x64xf32>, vector<1x64xf32> -> vector<1x64xf32>
    %cst_40 = arith.constant dense<0.000000e+00> : vector<1x64xf32>
    %110 = tpu.matmul %90, %41, %cst_40 {dimension_numbers = #tpu.dot_dimension_numbers<[1], [0], [0], [1], [0, 0, 1, 1], [], []>} : vector<1x8xf32>, vector<8x64xf32>, vector<1x64xf32> -> vector<1x64xf32>
    %111 = vector.broadcast %109 : vector<1x64xf32> to vector<16x64xf32>
    %112 = arith.mulf %98, %111 : vector<16x64xf32>
    %113 = vector.broadcast %110 : vector<1x64xf32> to vector<16x64xf32>
    %114 = arith.addf %112, %113 : vector<16x64xf32>
    %cst_41 = arith.constant 0.000000e+00 : f32
    %115 = vector.broadcast %cst_41 : f32 to vector<16x64xf32>
    %116 = arith.cmpf ogt, %114, %115 : vector<16x64xf32>
    %cst_42 = arith.constant 1.000000e-01 : f32
    %117 = vector.broadcast %cst_42 : f32 to vector<16x64xf32>
    %118 = arith.mulf %117, %114 : vector<16x64xf32>
    %119 = arith.select %116, %114, %118 : vector<16x64xi1>, vector<16x64xf32>
    %c0_43 = arith.constant 0 : index
    %c0_44 = arith.constant 0 : index
    %120 = vector.load %arg6[%c0_43, %c0_44] : memref<64x32xf32, #tpu.memory_space<vmem>>, vector<64x32xf32>
    %cst_45 = arith.constant dense<0.000000e+00> : vector<16x32xf32>
    %121 = tpu.matmul %119, %120, %cst_45 {dimension_numbers = #tpu.dot_dimension_numbers<[1], [0], [0], [1], [0, 0, 1, 1], [], []>} : vector<16x64xf32>, vector<64x32xf32>, vector<16x32xf32> -> vector<16x32xf32>
    %c0_46 = arith.constant 0 : index
    %c0_47 = arith.constant 0 : index
    %122 = vector.load %arg7[%c0_46, %c0_47] : memref<1x4xf32, #tpu.memory_space<vmem>>, vector<1x4xf32>
    %c0_48 = arith.constant 0 : index
    %c0_49 = arith.constant 0 : index
    %123 = vector.load %arg8[%c0_48, %c0_49] : memref<1x4xf32, #tpu.memory_space<vmem>>, vector<1x4xf32>
    %cst_50 = arith.constant dense<0.000000e+00> : vector<32xf32>
    %124 = vector.multi_reduction <add>, %121, %cst_50 [0] : vector<16x32xf32> to vector<32xf32>
    %125 = vector.shape_cast %124 : vector<32xf32> to vector<1x32xf32>
    %cst_51 = arith.constant dense<0.000000e+00> : vector<1x4xf32>
    %126 = tpu.matmul %125, %62, %cst_51 {dimension_numbers = #tpu.dot_dimension_numbers<[1], [0], [0], [1], [0, 0, 1, 1], [], []>} : vector<1x32xf32>, vector<32x4xf32>, vector<1x4xf32> -> vector<1x4xf32>
    %cst_52 = arith.constant 7.812500e-03 : f32
    %127 = vector.broadcast %cst_52 : f32 to vector<1x4xf32>
    %128 = arith.mulf %126, %127 : vector<1x4xf32>
    %cst_53 = arith.constant dense<0.000000e+00> : vector<1x32xf32>
    %129 = tpu.matmul %128, %83, %cst_53 {dimension_numbers = #tpu.dot_dimension_numbers<[1], [0], [0], [1], [0, 0, 1, 1], [], []>} : vector<1x4xf32>, vector<4x32xf32>, vector<1x32xf32> -> vector<1x32xf32>
    %130 = vector.broadcast %129 : vector<1x32xf32> to vector<16x32xf32>
    %131 = arith.subf %121, %130 : vector<16x32xf32>
    %132 = arith.mulf %131, %131 : vector<16x32xf32>
    %cst_54 = arith.constant dense<0.000000e+00> : vector<32xf32>
    %133 = vector.multi_reduction <add>, %132, %cst_54 [0] : vector<16x32xf32> to vector<32xf32>
    %134 = vector.shape_cast %133 : vector<32xf32> to vector<1x32xf32>
    %cst_55 = arith.constant dense<0.000000e+00> : vector<1x4xf32>
    %135 = tpu.matmul %134, %62, %cst_55 {dimension_numbers = #tpu.dot_dimension_numbers<[1], [0], [0], [1], [0, 0, 1, 1], [], []>} : vector<1x32xf32>, vector<32x4xf32>, vector<1x4xf32> -> vector<1x4xf32>
    %cst_56 = arith.constant 7.812500e-03 : f32
    %136 = vector.broadcast %cst_56 : f32 to vector<1x4xf32>
    %137 = arith.mulf %135, %136 : vector<1x4xf32>
    %cst_57 = arith.constant 9.99999974E-6 : f32
    %138 = vector.broadcast %cst_57 : f32 to vector<1x4xf32>
    %139 = arith.addf %137, %138 : vector<1x4xf32>
    %140 = math.rsqrt %139 : vector<1x4xf32>
    %141 = arith.mulf %122, %140 : vector<1x4xf32>
    %cst_58 = arith.constant dense<0.000000e+00> : vector<1x32xf32>
    %142 = tpu.matmul %141, %83, %cst_58 {dimension_numbers = #tpu.dot_dimension_numbers<[1], [0], [0], [1], [0, 0, 1, 1], [], []>} : vector<1x4xf32>, vector<4x32xf32>, vector<1x32xf32> -> vector<1x32xf32>
    %cst_59 = arith.constant dense<0.000000e+00> : vector<1x32xf32>
    %143 = tpu.matmul %123, %83, %cst_59 {dimension_numbers = #tpu.dot_dimension_numbers<[1], [0], [0], [1], [0, 0, 1, 1], [], []>} : vector<1x4xf32>, vector<4x32xf32>, vector<1x32xf32> -> vector<1x32xf32>
    %144 = vector.broadcast %142 : vector<1x32xf32> to vector<16x32xf32>
    %145 = arith.mulf %131, %144 : vector<16x32xf32>
    %146 = vector.broadcast %143 : vector<1x32xf32> to vector<16x32xf32>
    %147 = arith.addf %145, %146 : vector<16x32xf32>
    %cst_60 = arith.constant 0.000000e+00 : f32
    %148 = vector.broadcast %cst_60 : f32 to vector<16x32xf32>
    %149 = arith.cmpf ogt, %147, %148 : vector<16x32xf32>
    %cst_61 = arith.constant 1.000000e-01 : f32
    %150 = vector.broadcast %cst_61 : f32 to vector<16x32xf32>
    %151 = arith.mulf %150, %147 : vector<16x32xf32>
    %152 = arith.select %149, %147, %151 : vector<16x32xi1>, vector<16x32xf32>
    %cst_62 = arith.constant dense<0.000000e+00> : vector<16x32xf32>
    %153 = tpu.matmul %84, %152, %cst_62 {dimension_numbers = #tpu.dot_dimension_numbers<[1], [0], [0], [1], [0, 0, 1, 1], [], []>} : vector<16x16xf32>, vector<16x32xf32>, vector<16x32xf32> -> vector<16x32xf32>
    %cst_63 = arith.constant dense<0.000000e+00> : vector<16x32xf32>
    %154 = tpu.matmul %85, %152, %cst_63 {dimension_numbers = #tpu.dot_dimension_numbers<[1], [0], [0], [1], [0, 0, 1, 1], [], []>} : vector<16x16xf32>, vector<16x32xf32>, vector<16x32xf32> -> vector<16x32xf32>
    %c0_64 = arith.constant 0 : index
    %c0_65 = arith.constant 0 : index
    %c0_66 = arith.constant 0 : index
    %155 = vector.load %arg9[%c0_64, %c0_65, %c0_66] : memref<3x32x32xf32, #tpu.memory_space<vmem>>, vector<1x32x32xf32>
    %156 = vector.shape_cast %155 : vector<1x32x32xf32> to vector<32x32xf32>
    %cst_67 = arith.constant dense<0.000000e+00> : vector<16x32xf32>
    %157 = tpu.matmul %153, %156, %cst_67 {dimension_numbers = #tpu.dot_dimension_numbers<[1], [0], [0], [1], [0, 0, 1, 1], [], []>} : vector<16x32xf32>, vector<32x32xf32>, vector<16x32xf32> -> vector<16x32xf32>
    %c1 = arith.constant 1 : index
    %c0_68 = arith.constant 0 : index
    %c0_69 = arith.constant 0 : index
    %158 = vector.load %arg9[%c1, %c0_68, %c0_69] : memref<3x32x32xf32, #tpu.memory_space<vmem>>, vector<1x32x32xf32>
    %159 = vector.shape_cast %158 : vector<1x32x32xf32> to vector<32x32xf32>
    %cst_70 = arith.constant dense<0.000000e+00> : vector<16x32xf32>
    %160 = tpu.matmul %152, %159, %cst_70 {dimension_numbers = #tpu.dot_dimension_numbers<[1], [0], [0], [1], [0, 0, 1, 1], [], []>} : vector<16x32xf32>, vector<32x32xf32>, vector<16x32xf32> -> vector<16x32xf32>
    %161 = arith.addf %157, %160 : vector<16x32xf32>
    %c2 = arith.constant 2 : index
    %c0_71 = arith.constant 0 : index
    %c0_72 = arith.constant 0 : index
    %162 = vector.load %arg9[%c2, %c0_71, %c0_72] : memref<3x32x32xf32, #tpu.memory_space<vmem>>, vector<1x32x32xf32>
    %163 = vector.shape_cast %162 : vector<1x32x32xf32> to vector<32x32xf32>
    %cst_73 = arith.constant dense<0.000000e+00> : vector<16x32xf32>
    %164 = tpu.matmul %154, %163, %cst_73 {dimension_numbers = #tpu.dot_dimension_numbers<[1], [0], [0], [1], [0, 0, 1, 1], [], []>} : vector<16x32xf32>, vector<32x32xf32>, vector<16x32xf32> -> vector<16x32xf32>
    %165 = arith.addf %161, %164 : vector<16x32xf32>
    %c0_74 = arith.constant 0 : index
    %c0_75 = arith.constant 0 : index
    %166 = vector.load %arg10[%c0_74, %c0_75] : memref<1x4xf32, #tpu.memory_space<vmem>>, vector<1x4xf32>
    %c0_76 = arith.constant 0 : index
    %c0_77 = arith.constant 0 : index
    %167 = vector.load %arg11[%c0_76, %c0_77] : memref<1x4xf32, #tpu.memory_space<vmem>>, vector<1x4xf32>
    %cst_78 = arith.constant dense<0.000000e+00> : vector<32xf32>
    %168 = vector.multi_reduction <add>, %165, %cst_78 [0] : vector<16x32xf32> to vector<32xf32>
    %169 = vector.shape_cast %168 : vector<32xf32> to vector<1x32xf32>
    %cst_79 = arith.constant dense<0.000000e+00> : vector<1x4xf32>
    %170 = tpu.matmul %169, %62, %cst_79 {dimension_numbers = #tpu.dot_dimension_numbers<[1], [0], [0], [1], [0, 0, 1, 1], [], []>} : vector<1x32xf32>, vector<32x4xf32>, vector<1x4xf32> -> vector<1x4xf32>
    %cst_80 = arith.constant 7.812500e-03 : f32
    %171 = vector.broadcast %cst_80 : f32 to vector<1x4xf32>
    %172 = arith.mulf %170, %171 : vector<1x4xf32>
    %cst_81 = arith.constant dense<0.000000e+00> : vector<1x32xf32>
    %173 = tpu.matmul %172, %83, %cst_81 {dimension_numbers = #tpu.dot_dimension_numbers<[1], [0], [0], [1], [0, 0, 1, 1], [], []>} : vector<1x4xf32>, vector<4x32xf32>, vector<1x32xf32> -> vector<1x32xf32>
    %174 = vector.broadcast %173 : vector<1x32xf32> to vector<16x32xf32>
    %175 = arith.subf %165, %174 : vector<16x32xf32>
    %176 = arith.mulf %175, %175 : vector<16x32xf32>
    %cst_82 = arith.constant dense<0.000000e+00> : vector<32xf32>
    %177 = vector.multi_reduction <add>, %176, %cst_82 [0] : vector<16x32xf32> to vector<32xf32>
    %178 = vector.shape_cast %177 : vector<32xf32> to vector<1x32xf32>
    %cst_83 = arith.constant dense<0.000000e+00> : vector<1x4xf32>
    %179 = tpu.matmul %178, %62, %cst_83 {dimension_numbers = #tpu.dot_dimension_numbers<[1], [0], [0], [1], [0, 0, 1, 1], [], []>} : vector<1x32xf32>, vector<32x4xf32>, vector<1x4xf32> -> vector<1x4xf32>
    %cst_84 = arith.constant 7.812500e-03 : f32
    %180 = vector.broadcast %cst_84 : f32 to vector<1x4xf32>
    %181 = arith.mulf %179, %180 : vector<1x4xf32>
    %cst_85 = arith.constant 9.99999974E-6 : f32
    %182 = vector.broadcast %cst_85 : f32 to vector<1x4xf32>
    %183 = arith.addf %181, %182 : vector<1x4xf32>
    %184 = math.rsqrt %183 : vector<1x4xf32>
    %185 = arith.mulf %166, %184 : vector<1x4xf32>
    %cst_86 = arith.constant dense<0.000000e+00> : vector<1x32xf32>
    %186 = tpu.matmul %185, %83, %cst_86 {dimension_numbers = #tpu.dot_dimension_numbers<[1], [0], [0], [1], [0, 0, 1, 1], [], []>} : vector<1x4xf32>, vector<4x32xf32>, vector<1x32xf32> -> vector<1x32xf32>
    %cst_87 = arith.constant dense<0.000000e+00> : vector<1x32xf32>
    %187 = tpu.matmul %167, %83, %cst_87 {dimension_numbers = #tpu.dot_dimension_numbers<[1], [0], [0], [1], [0, 0, 1, 1], [], []>} : vector<1x4xf32>, vector<4x32xf32>, vector<1x32xf32> -> vector<1x32xf32>
    %188 = vector.broadcast %186 : vector<1x32xf32> to vector<16x32xf32>
    %189 = arith.mulf %175, %188 : vector<16x32xf32>
    %190 = vector.broadcast %187 : vector<1x32xf32> to vector<16x32xf32>
    %191 = arith.addf %189, %190 : vector<16x32xf32>
    %cst_88 = arith.constant 0.000000e+00 : f32
    %192 = vector.broadcast %cst_88 : f32 to vector<16x32xf32>
    %193 = arith.cmpf ogt, %191, %192 : vector<16x32xf32>
    %cst_89 = arith.constant 1.000000e-01 : f32
    %194 = vector.broadcast %cst_89 : f32 to vector<16x32xf32>
    %195 = arith.mulf %194, %191 : vector<16x32xf32>
    %196 = arith.select %193, %191, %195 : vector<16x32xi1>, vector<16x32xf32>
    %c0_90 = arith.constant 0 : index
    %c0_91 = arith.constant 0 : index
    %197 = vector.load %arg12[%c0_90, %c0_91] : memref<32x64xf32, #tpu.memory_space<vmem>>, vector<32x64xf32>
    %cst_92 = arith.constant dense<0.000000e+00> : vector<16x64xf32>
    %198 = tpu.matmul %196, %197, %cst_92 {dimension_numbers = #tpu.dot_dimension_numbers<[1], [0], [0], [1], [0, 0, 1, 1], [], []>} : vector<16x32xf32>, vector<32x64xf32>, vector<16x64xf32> -> vector<16x64xf32>
    %c0_93 = arith.constant 0 : index
    %c0_94 = arith.constant 0 : index
    %199 = vector.load %arg13[%c0_93, %c0_94] : memref<1x8xf32, #tpu.memory_space<vmem>>, vector<1x8xf32>
    %c0_95 = arith.constant 0 : index
    %c0_96 = arith.constant 0 : index
    %200 = vector.load %arg14[%c0_95, %c0_96] : memref<1x8xf32, #tpu.memory_space<vmem>>, vector<1x8xf32>
    %cst_97 = arith.constant dense<0.000000e+00> : vector<64xf32>
    %201 = vector.multi_reduction <add>, %198, %cst_97 [0] : vector<16x64xf32> to vector<64xf32>
    %202 = vector.shape_cast %201 : vector<64xf32> to vector<1x64xf32>
    %cst_98 = arith.constant dense<0.000000e+00> : vector<1x8xf32>
    %203 = tpu.matmul %202, %20, %cst_98 {dimension_numbers = #tpu.dot_dimension_numbers<[1], [0], [0], [1], [0, 0, 1, 1], [], []>} : vector<1x64xf32>, vector<64x8xf32>, vector<1x8xf32> -> vector<1x8xf32>
    %cst_99 = arith.constant 7.812500e-03 : f32
    %204 = vector.broadcast %cst_99 : f32 to vector<1x8xf32>
    %205 = arith.mulf %203, %204 : vector<1x8xf32>
    %cst_100 = arith.constant dense<0.000000e+00> : vector<1x64xf32>
    %206 = tpu.matmul %205, %41, %cst_100 {dimension_numbers = #tpu.dot_dimension_numbers<[1], [0], [0], [1], [0, 0, 1, 1], [], []>} : vector<1x8xf32>, vector<8x64xf32>, vector<1x64xf32> -> vector<1x64xf32>
    %207 = vector.broadcast %206 : vector<1x64xf32> to vector<16x64xf32>
    %208 = arith.subf %198, %207 : vector<16x64xf32>
    %209 = arith.mulf %208, %208 : vector<16x64xf32>
    %cst_101 = arith.constant dense<0.000000e+00> : vector<64xf32>
    %210 = vector.multi_reduction <add>, %209, %cst_101 [0] : vector<16x64xf32> to vector<64xf32>
    %211 = vector.shape_cast %210 : vector<64xf32> to vector<1x64xf32>
    %cst_102 = arith.constant dense<0.000000e+00> : vector<1x8xf32>
    %212 = tpu.matmul %211, %20, %cst_102 {dimension_numbers = #tpu.dot_dimension_numbers<[1], [0], [0], [1], [0, 0, 1, 1], [], []>} : vector<1x64xf32>, vector<64x8xf32>, vector<1x8xf32> -> vector<1x8xf32>
    %cst_103 = arith.constant 7.812500e-03 : f32
    %213 = vector.broadcast %cst_103 : f32 to vector<1x8xf32>
    %214 = arith.mulf %212, %213 : vector<1x8xf32>
    %cst_104 = arith.constant 9.99999974E-6 : f32
    %215 = vector.broadcast %cst_104 : f32 to vector<1x8xf32>
    %216 = arith.addf %214, %215 : vector<1x8xf32>
    %217 = math.rsqrt %216 : vector<1x8xf32>
    %218 = arith.mulf %199, %217 : vector<1x8xf32>
    %cst_105 = arith.constant dense<0.000000e+00> : vector<1x64xf32>
    %219 = tpu.matmul %218, %41, %cst_105 {dimension_numbers = #tpu.dot_dimension_numbers<[1], [0], [0], [1], [0, 0, 1, 1], [], []>} : vector<1x8xf32>, vector<8x64xf32>, vector<1x64xf32> -> vector<1x64xf32>
    %cst_106 = arith.constant dense<0.000000e+00> : vector<1x64xf32>
    %220 = tpu.matmul %200, %41, %cst_106 {dimension_numbers = #tpu.dot_dimension_numbers<[1], [0], [0], [1], [0, 0, 1, 1], [], []>} : vector<1x8xf32>, vector<8x64xf32>, vector<1x64xf32> -> vector<1x64xf32>
    %221 = vector.broadcast %219 : vector<1x64xf32> to vector<16x64xf32>
    %222 = arith.mulf %208, %221 : vector<16x64xf32>
    %223 = vector.broadcast %220 : vector<1x64xf32> to vector<16x64xf32>
    %224 = arith.addf %222, %223 : vector<16x64xf32>
    %cst_107 = arith.constant 0.000000e+00 : f32
    %225 = vector.broadcast %cst_107 : f32 to vector<16x64xf32>
    %226 = arith.cmpf ogt, %224, %225 : vector<16x64xf32>
    %cst_108 = arith.constant 1.000000e-01 : f32
    %227 = vector.broadcast %cst_108 : f32 to vector<16x64xf32>
    %228 = arith.mulf %227, %224 : vector<16x64xf32>
    %229 = arith.select %226, %224, %228 : vector<16x64xi1>, vector<16x64xf32>
    %230 = arith.addf %229, %119 : vector<16x64xf32>
    %c0_109 = arith.constant 0 : index
    %c0_110 = arith.constant 0 : index
    %231 = vector.load %arg15[%c0_109, %c0_110] : memref<64x32xf32, #tpu.memory_space<vmem>>, vector<64x32xf32>
    %cst_111 = arith.constant dense<0.000000e+00> : vector<16x32xf32>
    %232 = tpu.matmul %230, %231, %cst_111 {dimension_numbers = #tpu.dot_dimension_numbers<[1], [0], [0], [1], [0, 0, 1, 1], [], []>} : vector<16x64xf32>, vector<64x32xf32>, vector<16x32xf32> -> vector<16x32xf32>
    %c0_112 = arith.constant 0 : index
    %c0_113 = arith.constant 0 : index
    %233 = vector.load %arg16[%c0_112, %c0_113] : memref<1x4xf32, #tpu.memory_space<vmem>>, vector<1x4xf32>
    %c0_114 = arith.constant 0 : index
    %c0_115 = arith.constant 0 : index
    %234 = vector.load %arg17[%c0_114, %c0_115] : memref<1x4xf32, #tpu.memory_space<vmem>>, vector<1x4xf32>
    %cst_116 = arith.constant dense<0.000000e+00> : vector<32xf32>
    %235 = vector.multi_reduction <add>, %232, %cst_116 [0] : vector<16x32xf32> to vector<32xf32>
    %236 = vector.shape_cast %235 : vector<32xf32> to vector<1x32xf32>
    %cst_117 = arith.constant dense<0.000000e+00> : vector<1x4xf32>
    %237 = tpu.matmul %236, %62, %cst_117 {dimension_numbers = #tpu.dot_dimension_numbers<[1], [0], [0], [1], [0, 0, 1, 1], [], []>} : vector<1x32xf32>, vector<32x4xf32>, vector<1x4xf32> -> vector<1x4xf32>
    %cst_118 = arith.constant 7.812500e-03 : f32
    %238 = vector.broadcast %cst_118 : f32 to vector<1x4xf32>
    %239 = arith.mulf %237, %238 : vector<1x4xf32>
    %cst_119 = arith.constant dense<0.000000e+00> : vector<1x32xf32>
    %240 = tpu.matmul %239, %83, %cst_119 {dimension_numbers = #tpu.dot_dimension_numbers<[1], [0], [0], [1], [0, 0, 1, 1], [], []>} : vector<1x4xf32>, vector<4x32xf32>, vector<1x32xf32> -> vector<1x32xf32>
    %241 = vector.broadcast %240 : vector<1x32xf32> to vector<16x32xf32>
    %242 = arith.subf %232, %241 : vector<16x32xf32>
    %243 = arith.mulf %242, %242 : vector<16x32xf32>
    %cst_120 = arith.constant dense<0.000000e+00> : vector<32xf32>
    %244 = vector.multi_reduction <add>, %243, %cst_120 [0] : vector<16x32xf32> to vector<32xf32>
    %245 = vector.shape_cast %244 : vector<32xf32> to vector<1x32xf32>
    %cst_121 = arith.constant dense<0.000000e+00> : vector<1x4xf32>
    %246 = tpu.matmul %245, %62, %cst_121 {dimension_numbers = #tpu.dot_dimension_numbers<[1], [0], [0], [1], [0, 0, 1, 1], [], []>} : vector<1x32xf32>, vector<32x4xf32>, vector<1x4xf32> -> vector<1x4xf32>
    %cst_122 = arith.constant 7.812500e-03 : f32
    %247 = vector.broadcast %cst_122 : f32 to vector<1x4xf32>
    %248 = arith.mulf %246, %247 : vector<1x4xf32>
    %cst_123 = arith.constant 9.99999974E-6 : f32
    %249 = vector.broadcast %cst_123 : f32 to vector<1x4xf32>
    %250 = arith.addf %248, %249 : vector<1x4xf32>
    %251 = math.rsqrt %250 : vector<1x4xf32>
    %252 = arith.mulf %233, %251 : vector<1x4xf32>
    %cst_124 = arith.constant dense<0.000000e+00> : vector<1x32xf32>
    %253 = tpu.matmul %252, %83, %cst_124 {dimension_numbers = #tpu.dot_dimension_numbers<[1], [0], [0], [1], [0, 0, 1, 1], [], []>} : vector<1x4xf32>, vector<4x32xf32>, vector<1x32xf32> -> vector<1x32xf32>
    %cst_125 = arith.constant dense<0.000000e+00> : vector<1x32xf32>
    %254 = tpu.matmul %234, %83, %cst_125 {dimension_numbers = #tpu.dot_dimension_numbers<[1], [0], [0], [1], [0, 0, 1, 1], [], []>} : vector<1x4xf32>, vector<4x32xf32>, vector<1x32xf32> -> vector<1x32xf32>
    %255 = vector.broadcast %253 : vector<1x32xf32> to vector<16x32xf32>
    %256 = arith.mulf %242, %255 : vector<16x32xf32>
    %257 = vector.broadcast %254 : vector<1x32xf32> to vector<16x32xf32>
    %258 = arith.addf %256, %257 : vector<16x32xf32>
    %cst_126 = arith.constant 0.000000e+00 : f32
    %259 = vector.broadcast %cst_126 : f32 to vector<16x32xf32>
    %260 = arith.cmpf ogt, %258, %259 : vector<16x32xf32>
    %cst_127 = arith.constant 1.000000e-01 : f32
    %261 = vector.broadcast %cst_127 : f32 to vector<16x32xf32>
    %262 = arith.mulf %261, %258 : vector<16x32xf32>
    %263 = arith.select %260, %258, %262 : vector<16x32xi1>, vector<16x32xf32>
    %cst_128 = arith.constant dense<0.000000e+00> : vector<16x32xf32>
    %264 = tpu.matmul %84, %263, %cst_128 {dimension_numbers = #tpu.dot_dimension_numbers<[1], [0], [0], [1], [0, 0, 1, 1], [], []>} : vector<16x16xf32>, vector<16x32xf32>, vector<16x32xf32> -> vector<16x32xf32>
    %cst_129 = arith.constant dense<0.000000e+00> : vector<16x32xf32>
    %265 = tpu.matmul %85, %263, %cst_129 {dimension_numbers = #tpu.dot_dimension_numbers<[1], [0], [0], [1], [0, 0, 1, 1], [], []>} : vector<16x16xf32>, vector<16x32xf32>, vector<16x32xf32> -> vector<16x32xf32>
    %c0_130 = arith.constant 0 : index
    %c0_131 = arith.constant 0 : index
    %c0_132 = arith.constant 0 : index
    %266 = vector.load %arg18[%c0_130, %c0_131, %c0_132] : memref<3x32x32xf32, #tpu.memory_space<vmem>>, vector<1x32x32xf32>
    %267 = vector.shape_cast %266 : vector<1x32x32xf32> to vector<32x32xf32>
    %cst_133 = arith.constant dense<0.000000e+00> : vector<16x32xf32>
    %268 = tpu.matmul %264, %267, %cst_133 {dimension_numbers = #tpu.dot_dimension_numbers<[1], [0], [0], [1], [0, 0, 1, 1], [], []>} : vector<16x32xf32>, vector<32x32xf32>, vector<16x32xf32> -> vector<16x32xf32>
    %c1_134 = arith.constant 1 : index
    %c0_135 = arith.constant 0 : index
    %c0_136 = arith.constant 0 : index
    %269 = vector.load %arg18[%c1_134, %c0_135, %c0_136] : memref<3x32x32xf32, #tpu.memory_space<vmem>>, vector<1x32x32xf32>
    %270 = vector.shape_cast %269 : vector<1x32x32xf32> to vector<32x32xf32>
    %cst_137 = arith.constant dense<0.000000e+00> : vector<16x32xf32>
    %271 = tpu.matmul %263, %270, %cst_137 {dimension_numbers = #tpu.dot_dimension_numbers<[1], [0], [0], [1], [0, 0, 1, 1], [], []>} : vector<16x32xf32>, vector<32x32xf32>, vector<16x32xf32> -> vector<16x32xf32>
    %272 = arith.addf %268, %271 : vector<16x32xf32>
    %c2_138 = arith.constant 2 : index
    %c0_139 = arith.constant 0 : index
    %c0_140 = arith.constant 0 : index
    %273 = vector.load %arg18[%c2_138, %c0_139, %c0_140] : memref<3x32x32xf32, #tpu.memory_space<vmem>>, vector<1x32x32xf32>
    %274 = vector.shape_cast %273 : vector<1x32x32xf32> to vector<32x32xf32>
    %cst_141 = arith.constant dense<0.000000e+00> : vector<16x32xf32>
    %275 = tpu.matmul %265, %274, %cst_141 {dimension_numbers = #tpu.dot_dimension_numbers<[1], [0], [0], [1], [0, 0, 1, 1], [], []>} : vector<16x32xf32>, vector<32x32xf32>, vector<16x32xf32> -> vector<16x32xf32>
    %276 = arith.addf %272, %275 : vector<16x32xf32>
    %c0_142 = arith.constant 0 : index
    %c0_143 = arith.constant 0 : index
    %277 = vector.load %arg19[%c0_142, %c0_143] : memref<1x4xf32, #tpu.memory_space<vmem>>, vector<1x4xf32>
    %c0_144 = arith.constant 0 : index
    %c0_145 = arith.constant 0 : index
    %278 = vector.load %arg20[%c0_144, %c0_145] : memref<1x4xf32, #tpu.memory_space<vmem>>, vector<1x4xf32>
    %cst_146 = arith.constant dense<0.000000e+00> : vector<32xf32>
    %279 = vector.multi_reduction <add>, %276, %cst_146 [0] : vector<16x32xf32> to vector<32xf32>
    %280 = vector.shape_cast %279 : vector<32xf32> to vector<1x32xf32>
    %cst_147 = arith.constant dense<0.000000e+00> : vector<1x4xf32>
    %281 = tpu.matmul %280, %62, %cst_147 {dimension_numbers = #tpu.dot_dimension_numbers<[1], [0], [0], [1], [0, 0, 1, 1], [], []>} : vector<1x32xf32>, vector<32x4xf32>, vector<1x4xf32> -> vector<1x4xf32>
    %cst_148 = arith.constant 7.812500e-03 : f32
    %282 = vector.broadcast %cst_148 : f32 to vector<1x4xf32>
    %283 = arith.mulf %281, %282 : vector<1x4xf32>
    %cst_149 = arith.constant dense<0.000000e+00> : vector<1x32xf32>
    %284 = tpu.matmul %283, %83, %cst_149 {dimension_numbers = #tpu.dot_dimension_numbers<[1], [0], [0], [1], [0, 0, 1, 1], [], []>} : vector<1x4xf32>, vector<4x32xf32>, vector<1x32xf32> -> vector<1x32xf32>
    %285 = vector.broadcast %284 : vector<1x32xf32> to vector<16x32xf32>
    %286 = arith.subf %276, %285 : vector<16x32xf32>
    %287 = arith.mulf %286, %286 : vector<16x32xf32>
    %cst_150 = arith.constant dense<0.000000e+00> : vector<32xf32>
    %288 = vector.multi_reduction <add>, %287, %cst_150 [0] : vector<16x32xf32> to vector<32xf32>
    %289 = vector.shape_cast %288 : vector<32xf32> to vector<1x32xf32>
    %cst_151 = arith.constant dense<0.000000e+00> : vector<1x4xf32>
    %290 = tpu.matmul %289, %62, %cst_151 {dimension_numbers = #tpu.dot_dimension_numbers<[1], [0], [0], [1], [0, 0, 1, 1], [], []>} : vector<1x32xf32>, vector<32x4xf32>, vector<1x4xf32> -> vector<1x4xf32>
    %cst_152 = arith.constant 7.812500e-03 : f32
    %291 = vector.broadcast %cst_152 : f32 to vector<1x4xf32>
    %292 = arith.mulf %290, %291 : vector<1x4xf32>
    %cst_153 = arith.constant 9.99999974E-6 : f32
    %293 = vector.broadcast %cst_153 : f32 to vector<1x4xf32>
    %294 = arith.addf %292, %293 : vector<1x4xf32>
    %295 = math.rsqrt %294 : vector<1x4xf32>
    %296 = arith.mulf %277, %295 : vector<1x4xf32>
    %cst_154 = arith.constant dense<0.000000e+00> : vector<1x32xf32>
    %297 = tpu.matmul %296, %83, %cst_154 {dimension_numbers = #tpu.dot_dimension_numbers<[1], [0], [0], [1], [0, 0, 1, 1], [], []>} : vector<1x4xf32>, vector<4x32xf32>, vector<1x32xf32> -> vector<1x32xf32>
    %cst_155 = arith.constant dense<0.000000e+00> : vector<1x32xf32>
    %298 = tpu.matmul %278, %83, %cst_155 {dimension_numbers = #tpu.dot_dimension_numbers<[1], [0], [0], [1], [0, 0, 1, 1], [], []>} : vector<1x4xf32>, vector<4x32xf32>, vector<1x32xf32> -> vector<1x32xf32>
    %299 = vector.broadcast %297 : vector<1x32xf32> to vector<16x32xf32>
    %300 = arith.mulf %286, %299 : vector<16x32xf32>
    %301 = vector.broadcast %298 : vector<1x32xf32> to vector<16x32xf32>
    %302 = arith.addf %300, %301 : vector<16x32xf32>
    %cst_156 = arith.constant 0.000000e+00 : f32
    %303 = vector.broadcast %cst_156 : f32 to vector<16x32xf32>
    %304 = arith.cmpf ogt, %302, %303 : vector<16x32xf32>
    %cst_157 = arith.constant 1.000000e-01 : f32
    %305 = vector.broadcast %cst_157 : f32 to vector<16x32xf32>
    %306 = arith.mulf %305, %302 : vector<16x32xf32>
    %307 = arith.select %304, %302, %306 : vector<16x32xi1>, vector<16x32xf32>
    %c0_158 = arith.constant 0 : index
    %c0_159 = arith.constant 0 : index
    %308 = vector.load %arg21[%c0_158, %c0_159] : memref<32x64xf32, #tpu.memory_space<vmem>>, vector<32x64xf32>
    %cst_160 = arith.constant dense<0.000000e+00> : vector<16x64xf32>
    %309 = tpu.matmul %307, %308, %cst_160 {dimension_numbers = #tpu.dot_dimension_numbers<[1], [0], [0], [1], [0, 0, 1, 1], [], []>} : vector<16x32xf32>, vector<32x64xf32>, vector<16x64xf32> -> vector<16x64xf32>
    %c0_161 = arith.constant 0 : index
    %c0_162 = arith.constant 0 : index
    %310 = vector.load %arg22[%c0_161, %c0_162] : memref<1x8xf32, #tpu.memory_space<vmem>>, vector<1x8xf32>
    %c0_163 = arith.constant 0 : index
    %c0_164 = arith.constant 0 : index
    %311 = vector.load %arg23[%c0_163, %c0_164] : memref<1x8xf32, #tpu.memory_space<vmem>>, vector<1x8xf32>
    %cst_165 = arith.constant dense<0.000000e+00> : vector<64xf32>
    %312 = vector.multi_reduction <add>, %309, %cst_165 [0] : vector<16x64xf32> to vector<64xf32>
    %313 = vector.shape_cast %312 : vector<64xf32> to vector<1x64xf32>
    %cst_166 = arith.constant dense<0.000000e+00> : vector<1x8xf32>
    %314 = tpu.matmul %313, %20, %cst_166 {dimension_numbers = #tpu.dot_dimension_numbers<[1], [0], [0], [1], [0, 0, 1, 1], [], []>} : vector<1x64xf32>, vector<64x8xf32>, vector<1x8xf32> -> vector<1x8xf32>
    %cst_167 = arith.constant 7.812500e-03 : f32
    %315 = vector.broadcast %cst_167 : f32 to vector<1x8xf32>
    %316 = arith.mulf %314, %315 : vector<1x8xf32>
    %cst_168 = arith.constant dense<0.000000e+00> : vector<1x64xf32>
    %317 = tpu.matmul %316, %41, %cst_168 {dimension_numbers = #tpu.dot_dimension_numbers<[1], [0], [0], [1], [0, 0, 1, 1], [], []>} : vector<1x8xf32>, vector<8x64xf32>, vector<1x64xf32> -> vector<1x64xf32>
    %318 = vector.broadcast %317 : vector<1x64xf32> to vector<16x64xf32>
    %319 = arith.subf %309, %318 : vector<16x64xf32>
    %320 = arith.mulf %319, %319 : vector<16x64xf32>
    %cst_169 = arith.constant dense<0.000000e+00> : vector<64xf32>
    %321 = vector.multi_reduction <add>, %320, %cst_169 [0] : vector<16x64xf32> to vector<64xf32>
    %322 = vector.shape_cast %321 : vector<64xf32> to vector<1x64xf32>
    %cst_170 = arith.constant dense<0.000000e+00> : vector<1x8xf32>
    %323 = tpu.matmul %322, %20, %cst_170 {dimension_numbers = #tpu.dot_dimension_numbers<[1], [0], [0], [1], [0, 0, 1, 1], [], []>} : vector<1x64xf32>, vector<64x8xf32>, vector<1x8xf32> -> vector<1x8xf32>
    %cst_171 = arith.constant 7.812500e-03 : f32
    %324 = vector.broadcast %cst_171 : f32 to vector<1x8xf32>
    %325 = arith.mulf %323, %324 : vector<1x8xf32>
    %cst_172 = arith.constant 9.99999974E-6 : f32
    %326 = vector.broadcast %cst_172 : f32 to vector<1x8xf32>
    %327 = arith.addf %325, %326 : vector<1x8xf32>
    %328 = math.rsqrt %327 : vector<1x8xf32>
    %329 = arith.mulf %310, %328 : vector<1x8xf32>
    %cst_173 = arith.constant dense<0.000000e+00> : vector<1x64xf32>
    %330 = tpu.matmul %329, %41, %cst_173 {dimension_numbers = #tpu.dot_dimension_numbers<[1], [0], [0], [1], [0, 0, 1, 1], [], []>} : vector<1x8xf32>, vector<8x64xf32>, vector<1x64xf32> -> vector<1x64xf32>
    %cst_174 = arith.constant dense<0.000000e+00> : vector<1x64xf32>
    %331 = tpu.matmul %311, %41, %cst_174 {dimension_numbers = #tpu.dot_dimension_numbers<[1], [0], [0], [1], [0, 0, 1, 1], [], []>} : vector<1x8xf32>, vector<8x64xf32>, vector<1x64xf32> -> vector<1x64xf32>
    %332 = vector.broadcast %330 : vector<1x64xf32> to vector<16x64xf32>
    %333 = arith.mulf %319, %332 : vector<16x64xf32>
    %334 = vector.broadcast %331 : vector<1x64xf32> to vector<16x64xf32>
    %335 = arith.addf %333, %334 : vector<16x64xf32>
    %cst_175 = arith.constant 0.000000e+00 : f32
    %336 = vector.broadcast %cst_175 : f32 to vector<16x64xf32>
    %337 = arith.cmpf ogt, %335, %336 : vector<16x64xf32>
    %cst_176 = arith.constant 1.000000e-01 : f32
    %338 = vector.broadcast %cst_176 : f32 to vector<16x64xf32>
    %339 = arith.mulf %338, %335 : vector<16x64xf32>
    %340 = arith.select %337, %335, %339 : vector<16x64xi1>, vector<16x64xf32>
    %341 = arith.addf %340, %230 : vector<16x64xf32>
    %c0_177 = arith.constant 0 : index
    %c0_178 = arith.constant 0 : index
    %342 = vector.load %arg24[%c0_177, %c0_178] : memref<16x64xf32, #tpu.memory_space<vmem>>, vector<16x64xf32>
    tpu.vector_store %arg24[%c0_177, %c0_178], %341 {strides = array<i32>} : memref<16x64xf32, #tpu.memory_space<vmem>>, vector<16x64xf32>,
    return
  }
}

</mosaic_0001>

<bundles_post_ra>
// kernel: down_block_forward.1
= control target key start
LH: loop header
LB: loop body
LE: loop exit
PB: predicated region body
PF: predicated region fallthrough
CT: control target
= control target key end

     0   :  { %v5414_v0 = vmov 0.0   ;;  %vm6624_vm0 = vcmask 523264   ;;  %v77_v29 = vlaneseq  ;;  %v5415_v38 = vmov 1.0   ;;  %s6593_s3 = inlined_call_operand.vmem [shape: f32[192,64], index: 3, kind: input, shape index: {}]   ;;  %s6594_s0 = inlined_call_operand.vmem [shape: f32[16,192], index: 0, kind: input, shape index: {}]   ;;  %s6595_s4 = inlined_call_operand.vmem [shape: f32[1,8], index: 4, kind: input, shape index: {}]   ;;  %s6596_s6 = inlined_call_operand.vmem [shape: f32[64,32], index: 6, kind: input, shape index: {}]   ;;  %s6597_s5 = inlined_call_operand.vmem [shape: f32[1,8], index: 5, kind: input, shape index: {}]   ;;  %s6598_s7 = inlined_call_operand.vmem [shape: f32[1,4], index: 7, kind: input, shape index: {}]   ;;  %s6599_s8 = inlined_call_operand.vmem [shape: f32[1,4], index: 8, kind: input, shape index: {}]   ;;  %s6600_s1 = inlined_call_operand.vmem [shape: f32[16,16], index: 1, kind: input, shape index: {}]   ;;  %s6601_s2 = inlined_call_operand.vmem [shape: f32[16,16], index: 2, kind: input, shape index: {}]   ;;  %s6602_s9 = inlined_call_operand.vmem [shape: f32[3,32,32], index: 9, kind: input, shape index: {}]   ;;  %s6603_s10 = inlined_call_operand.vmem [shape: f32[1,4], index: 10, kind: input, shape index: {}]   ;;  %s6604_s11 = inlined_call_operand.vmem [shape: f32[1,4], index: 11, kind: input, shape index: {}]   ;;  %s6605_s12 = inlined_call_operand.vmem [shape: f32[32,64], index: 12, kind: input, shape index: {}]   ;;  %s6606_s13 = inlined_call_operand.vmem [shape: f32[1,8], index: 13, kind: input, shape index: {}]   ;;  %s6607_s15 = inlined_call_operand.vmem [shape: f32[64,32], index: 15, kind: input, shape index: {}]   ;;  %s6608_s14 = inlined_call_operand.vmem [shape: f32[1,8], index: 14, kind: input, shape index: {}]   ;;  %s6609_s16 = inlined_call_operand.vmem [shape: f32[1,4], index: 16, kind: input, shape index: {}]   ;;  %s6610_s17 = inlined_call_operand.vmem [shape: f32[1,4], index: 17, kind: input, shape index: {}]   ;;  %s6611_s18 = inlined_call_operand.vmem [shape: f32[3,32,32], index: 18, kind: input, shape index: {}]   ;;  %s6612_s19 = inlined_call_operand.vmem [shape: f32[1,4], index: 19, kind: input, shape index: {}]   ;;  %s6613_s20 = inlined_call_operand.vmem [shape: f32[1,4], index: 20, kind: input, shape index: {}]   ;;  %s6614_s21 = inlined_call_operand.vmem [shape: f32[32,64], index: 21, kind: input, shape index: {}]   ;;  %s6615_s22 = inlined_call_operand.vmem [shape: f32[1,8], index: 22, kind: input, shape index: {}]   ;;  %s6616_s23 = inlined_call_operand.vmem [shape: f32[1,8], index: 23, kind: input, shape index: {}]   ;;  %s6617_s24 = inlined_call_operand.vmem [shape: f32[16,64], index: 24, kind: output, shape index: {}]  }
   0x1   :  { %6648 = sst [smem:[#allocation2_spill]] %s6593_s3  ;;  %337 = vmatprep.subr.mxu0 %v5414_v0  ;;  %4936 = vmatprep.subr.mxu1 %v5414_v0  ;;  %v6671_v53 = vmov 0  ;;  %vm6628_vm8 = vmmov 0   ;;  %v6673_v55 = vmov 0  ;;  %vm6623_vm11 = vcmask 64512  }
   0x2   :  { %6649 = sst [smem:[#allocation3_spill]] %s6594_s0  ;;  %v5654_v30 = vshrl.u32 %v77_v29, 7  ;;  %v5657_v32 = vand.u32 127, %v77_v29  ;;  %4952 = vmatprep.mubr.msk.f32.mxu1 %vm6628_vm8, %v5414_v0 }
   0x3   :  { %6650 = sst [smem:[#allocation4_spill]] %s6595_s4 }
   0x4   :  { %6651 = sst [smem:[#allocation5_spill]] %s6596_s6  ;;  %v85_v31 = vadd.s32 56, %v5654_v30  ;;  %v84_v34 = vadd.s32 48, %v5654_v30  ;;  %v83_v37 = vadd.s32 40, %v5654_v30  ;;  %v82_v41 = vadd.s32 32, %v5654_v30 }
   0x5   :  { %6652 = sst [smem:[#allocation6_spill]] %s6597_s5  ;;  %v5686_v44 = vadd.s32 24, %v5654_v30  ;;  %v5699_v47 = vadd.s32 16, %v5654_v30  ;;  %v5712_v50 = vadd.s32 8, %v5654_v30  ;;  %v92_v54 = vand.u32 7, %v5654_v30 }
   0x6   :  { %6653 = sst [smem:[#allocation7_spill]] %s6598_s7  ;;  %v141_v33 = vand.u32 7, %v85_v31  ;;  %v134_v36 = vand.u32 7, %v84_v34  ;;  %v127_v40 = vand.u32 7, %v83_v37  ;;  %v120_v43 = vand.u32 7, %v82_v41 }
   0x7   :  { %6654 = sst [smem:[#allocation8_spill]] %s6599_s8  ;;  %v113_v46 = vand.u32 7, %v5686_v44  ;;  %v106_v49 = vand.u32 7, %v5699_v47  ;;  %v99_v52 = vand.u32 7, %v5712_v50  ;;  %vm5741_vm9 = vcmp.eq.s32.totalorder %v92_v54, %v5657_v32 }
   0x8   :  { %6655 = sst [smem:[#allocation9_spill]] %s6600_s1  ;;  %vm5661_vm1 = vcmp.eq.s32.totalorder %v141_v33, %v5657_v32  ;;  %vm5671_vm2 = vcmp.eq.s32.totalorder %v134_v36, %v5657_v32  ;;  %vm5681_vm3 = vcmp.eq.s32.totalorder %v127_v40, %v5657_v32  ;;  %vm5693_vm4 = vcmp.eq.s32.totalorder %v120_v43, %v5657_v32 }
   0x9   :  { %6656 = sst [smem:[#allocation10_spill]] %s6601_s2  ;;  %4937 = vmatpush3.msk.msra.mxu1 %vm5661_vm1, %v5415_v38  ;;  %vm5706_vm5 = vcmp.eq.s32.totalorder %v113_v46, %v5657_v32  ;;  %vm5719_vm6 = vcmp.eq.s32.totalorder %v106_v49, %v5657_v32  ;;  %vm5729_vm7 = vcmp.eq.s32.totalorder %v99_v52, %v5657_v32  ;;  %v6674_v55 = vsel %vm5741_vm9, 4294967295, %v6673_v55 }
   0xa   :  { %s6657_s27 = sld [smem:[#allocation2_spill]]  ;;  %4938 = vmatprep.subr.mxu1 %v5414_v0  ;;  %v6672_v53 = vsel %vm5729_vm7, 4294967295, %v6671_v53 }
   0xb   :  { %s6658_s7 = sld [smem:[#allocation3_spill]]  ;;  %4939 = vmatpush3.msk.msra.mxu1 %vm5671_vm2, %v5415_v38 }
   0xc   :  { %4940 = vmatprep.subr.mxu1 %v5414_v0  ;;  %s6677_s4 = sld [smem:[#allocation4_spill]] }
   0xd   :  { %4941 = vmatpush3.msk.msra.mxu1 %vm5681_vm3, %v5415_v38  ;;  %s6678_s3 = sld [smem:[#allocation5_spill]] }
   0xe   :  { %4942 = vmatprep.subr.mxu1 %v5414_v0  ;;  %s6679_s6 = sld [smem:[#allocation6_spill]] }
   0xf   :  { %4943 = vmatpush3.msk.msra.mxu1 %vm5693_vm4, %v5415_v38  ;;  %s6691_s5 = sld [smem:[#allocation7_spill]] }
  0x10   :  { %v321_v1 = vld [vmem:[%s6657_s27 + $0x78] sm:$0xff]  ;;  %v320_v2 = vld [vmem:[%s6657_s27 + $0x70] sm:$0xff]  ;;  %v319_v3 = vld [vmem:[%s6657_s27 + $0x68] sm:$0xff]  ;;  %4944 = vmatprep.subr.mxu1 %v5414_v0  ;;  %s6694_s28 = sld [smem:[#allocation8_spill]] }
  0x11   :  { %338 = vmatpush1.msra.mxu0 %v321_v1  ;;  %v318_v4 = vld [vmem:[%s6657_s27 + $0x60] sm:$0xff]  ;;  %v317_v5 = vld [vmem:[%s6657_s27 + $0x58] sm:$0xff]  ;;  %v316_v6 = vld [vmem:[%s6657_s27 + $0x50] sm:$0xff]  ;;  %4945 = vmatpush3.msk.msra.mxu1 %vm5706_vm5, %v5415_v38  ;;  %s6696_s29 = sld [smem:[#allocation10_spill]] }
  0x12   :  { %339 = vmatprep.subr.mxu0 %v5414_v0  ;;  %v303_v7 = vld [vmem:[%s6658_s7 + $0x8] sm:$0xff]  ;;  %v314_v9 = vld [vmem:[%s6657_s27 + $0x40] sm:$0xff]  ;;  %v313_v10 = vld [vmem:[%s6657_s27 + $0x38] sm:$0xff]  ;;  %4946 = vmatprep.subr.mxu1 %v5414_v0 }
  0x13   :  { %340 = vmatpush1.msra.mxu0 %v320_v2  ;;  %4534 = vmatprep.mubr.msk.f32.mxu0 %vm6624_vm0, %v303_v7  ;;  %v315_v8 = vld [vmem:[%s6657_s27 + $0x48] sm:$0xff]  ;;  %v312_v11 = vld [vmem:[%s6657_s27 + $0x30] sm:$0xff]  ;;  %v310_v13 = vld [vmem:[%s6657_s27 + $0x20] sm:$0xff]  ;;  %v6675_v7 = vmov 0 }
  0x14   :  { %341 = vmatprep.subr.mxu0 %v5414_v0  ;;  %v311_v12 = vld [vmem:[%s6657_s27 + $0x28] sm:$0xff]  ;;  %v309_v14 = vld [vmem:[%s6657_s27 + $0x18] sm:$0xff]  ;;  %v308_v15 = vld [vmem:[%s6657_s27 + $0x10] sm:$0xff]  ;;  %4947 = vmatpush3.msk.msra.mxu1 %vm5719_vm6, %v5415_v38 }
  0x15   :  { %342 = vmatpush1.msra.mxu0 %v319_v3  ;;  %v307_v16 = vld [vmem:[%s6657_s27 + $0x8] sm:$0xff]  ;;  %v306_v17 = vld [vmem:[%s6657_s27] sm:$0xff]  ;;  %v329_v18 = vld [vmem:[%s6657_s27 + $0xb8] sm:$0xff]  ;;  %4948 = vmatprep.subr.mxu1 %v5414_v0 }
  0x16   :  { %343 = vmatprep.subr.mxu0 %v5414_v0  ;;  %v328_v19 = vld [vmem:[%s6657_s27 + $0xb0] sm:$0xff]  ;;  %v327_v20 = vld [vmem:[%s6657_s27 + $0xa8] sm:$0xff]  ;;  %v326_v21 = vld [vmem:[%s6657_s27 + $0xa0] sm:$0xff]  ;;  %4949 = vmatpush3.msk.msra.mxu1 %vm5729_vm7, %v5415_v38 }
  0x17   :  { %344 = vmatpush1.msra.mxu0 %v318_v4  ;;  %v325_v22 = vld [vmem:[%s6657_s27 + $0x98] sm:$0xff]  ;;  %v324_v23 = vld [vmem:[%s6657_s27 + $0x90] sm:$0xff]  ;;  %v323_v24 = vld [vmem:[%s6657_s27 + $0x88] sm:$0xff]  ;;  %4950 = vmatprep.subr.mxu1 %v5414_v0 }
  0x18   :  { %345 = vmatprep.subr.mxu0 %v5414_v0  ;;  %v322_v25 = vld [vmem:[%s6657_s27 + $0x80] sm:$0xff]  ;;  %v305_v27 = vld [vmem:[%s6658_s7 + $0x18] sm:$0xff]  ;;  %v304_v28 = vld [vmem:[%s6658_s7 + $0x10] sm:$0xff]  ;;  %4951 = vmatpush3.msk.msra.mxu1 %vm5741_vm9, %v5415_v38 }
  0x19   :  { %346 = vmatpush1.msra.mxu0 %v317_v5  ;;  %v302_v26 = vld [vmem:[%s6658_s7] sm:$0xff]  ;;  %4955 = vmatprep.subr.mxu1 %v5414_v0  ;;  %v836_v40 = vld [vmem:[%s6678_s3 + $0x38] sm:$0xff]  ;;  %v835_v43 = vld [vmem:[%s6678_s3 + $0x30] sm:$0xff]  ;;  %s6695_s7 = sld [smem:[#allocation9_spill]] }
  0x1a   :  { %347 = vmatprep.subr.mxu0 %v5414_v0  ;;  %v412_v34 = vld [vmem:[%s6677_s4] sm:$0x1]  ;;  %v834_v46 = vld [vmem:[%s6678_s3 + $0x28] sm:$0xff]  ;;  %v832_v52 = vld [vmem:[%s6678_s3 + $0x18] sm:$0xff] }
  0x1b   :  { %348 = vmatpush1.msra.mxu0 %v316_v6  ;;  %v212_v6 = vand.u32 7, %v5657_v32  ;;  %v413_v41 = vld [vmem:[%s6679_s6] sm:$0x1]  ;;  %v831_v54 = vld [vmem:[%s6678_s3 + $0x10] sm:$0xff] }
  0x1c   :  { %349 = vmatprep.subr.mxu0 %v5414_v0  ;;  %v833_v49 = vld [vmem:[%s6678_s3 + $0x20] sm:$0xff] }
  0x1d   :  { %350 = vmatpush1.msra.mxu0 %v315_v8  ;;  %vm5758_vm10 = vcmp.eq.s32.totalorder %v212_v6, %v5654_v30 }
  0x1e   :  { %351 = vmatprep.subr.mxu0 %v5414_v0  ;;  %v6676_v7 = vsel %vm5758_vm10, 4294967295, %v6675_v7 }
  0x1f   :  { %352 = vmatpush1.msra.mxu0 %v314_v9 }
  0x20   :  { %353 = vmatprep.subr.mxu0 %v5414_v0 }
  0x21   :  { %354 = vmatpush1.msra.mxu0 %v313_v10 }
  0x22   :  { %355 = vmatprep.subr.mxu0 %v5414_v0 }
  0x23   :  { %356 = vmatpush1.msra.mxu0 %v312_v11  ;;  %v5802_v11 = vsub.s32 0, %v5654_v30 }
  0x24   :  { %357 = vmatprep.subr.mxu0 %v5414_v0 }
  0x25   :  { %358 = vmatpush1.msra.mxu0 %v311_v12 }
  0x26   :  { %359 = vmatprep.subr.mxu0 %v5414_v0 }
  0x27   :  { %360 = vmatpush1.msra.mxu0 %v310_v13 }
  0x28   :  { %361 = vmatprep.subr.mxu0 %v5414_v0 }
  0x29   :  { %362 = vmatpush1.msra.mxu0 %v309_v14 }
  0x2a   :  { %363 = vmatprep.subr.mxu0 %v5414_v0 }
  0x2b   :  { %364 = vmatpush1.msra.mxu0 %v308_v15 }
  0x2c   :  { %365 = vmatprep.subr.mxu0 %v5414_v0 }
  0x2d   :  { %366 = vmatpush1.msra.mxu0 %v307_v16 }
  0x2e   :  { %367 = vmatprep.subr.mxu0 %v5414_v0 }
  0x2f   :  { %368 = vmatpush1.msra.mxu0 %v306_v17 }
  0x30   :  { %385 = vmatprep.subr.mxu0 %v5414_v0 }
  0x31   :  { %386 = vmatpush2.msra.mxu0 %v329_v18 }
  0x32   :  { %387 = vmatprep.subr.mxu0 %v5414_v0 }
  0x33   :  { %388 = vmatpush2.msra.mxu0 %v328_v19 }
  0x34   :  { %389 = vmatprep.subr.mxu0 %v5414_v0 }
  0x35   :  { %390 = vmatpush2.msra.mxu0 %v327_v20 }
  0x36   :  { %391 = vmatprep.subr.mxu0 %v5414_v0 }
  0x37   :  { %392 = vmatpush2.msra.mxu0 %v326_v21 }
  0x38   :  { %393 = vmatprep.subr.mxu0 %v5414_v0 }
  0x39   :  { %394 = vmatpush2.msra.mxu0 %v325_v22 }
  0x3a   :  { %395 = vmatprep.subr.mxu0 %v5414_v0 }
  0x3b   :  { %396 = vmatpush2.msra.mxu0 %v324_v23 }
  0x3c   :  { %397 = vmatprep.subr.mxu0 %v5414_v0 }
  0x3d   :  { %398 = vmatpush2.msra.mxu0 %v323_v24 }
  0x3e   :  { %399 = vmatprep.subr.mxu0 %v5414_v0 }
  0x3f   :  { %400 = vmatpush2.msra.mxu0 %v322_v25 }
  0x40   :  { %402 = vmatmul.mubr.f32.vlgmr.msra.gmra.mxu0 %v302_v26  ;;  %5008 = vmatprep.subr.mxu0 %v5414_v0 }
  0x41   :  { %4535 = vmatprep.mubr.msk.f32.mxu0 %vm6624_vm0, %v305_v27 }
  0x44   :  { %407 = vmatmul.mubr.f32.gmra.mxu0 %v304_v28 }
  0x45   :  { %5016 = vmatprep.mubr.msk.f32.mxu0 %vm6628_vm8, %v5414_v0 }
 0x100   :  { %v403_v56 = vpop.f32.mrf.mxu0 }
 0x101   :  { %v414_v59 = vsel %vm6624_vm0, %v403_v56, 0.0 }
 0x102   :  { %v405_v57 = vpop.f32.mrf.mxu0 }
 0x103   :  { %v829_v57 = vld [vmem:[%s6678_s3] sm:$0xff] }
 0x104   :  { %v408_v58 = vpop.f32.mrf.mxu0 }
 0x105   :  { %v415_v60 = vsel %vm6624_vm0, %v408_v58, 0.0 }
 0x106   :  { %v416_v61 = vadd.f32 %v415_v60, %v414_v59  ;;  %v410_v62 = vpop.f32.mrf.mxu0 }
 0x108   :  { %v417_v63 = vrot.slane %v416_v61, 4 }
 0x10a   :  { %v418_v1 = vadd.f32 %v417_v63, %v416_v61 }
 0x10c   :  { %v419_v2 = vrot.slane %v418_v1, 2 }
 0x10e   :  { %v420_v3 = vadd.f32 %v419_v2, %v418_v1 }
 0x110   :  { %v421_v4 = vrot.slane %v420_v3, 1 }
 0x112   :  { %v422_v5 = vadd.f32 %v421_v4, %v420_v3 }
 0x114   :  { %4953 = vmatmul.mubr.msk.f32.vlgmr.msra.gmra.mxu1 %vm6624_vm0, %v422_v5 }
 0x115   :  { %4957 = vmatprep.mubr.msk.f32.mxu1 %vm6628_vm8, %v5414_v0  ;;  %4956 = vmatpush3.msk.msra.mxu1 %vm5758_vm10, %v5415_v38 }
 0x116   :  { %4960 = vmatprep.subr.mxu1 %v5414_v0 }
 0x1d4   :  { %v492_v8 = vpop.f32.mrf.mxu1 }
 0x1d5   :  { %v496_v9 = vmul.f32 0.0078125, %v492_v8 }
 0x1d6   :  { %v4954_v10 = vpop.f32.mrf.mxu1 }
 0x1d7   :  { %4958 = vmatmul.mubr.msk.f32.vlgmr.msra.gmra.mxu1 %vm6623_vm11, %v496_v9  ;;  %v248_v10 = vand.u32 3, %v5686_v44  ;;  %v6684_v44 = vmov 0 }
 0x1d8   :  { %4961 = vmatpush3.msk.msra.mxu1 %vm5661_vm1, %v5415_v38  ;;  %4976 = vmatprep.mubr.msk.f32.mxu1 %vm6628_vm8, %v5414_v0 }
 0x1d9   :  { %4962 = vmatprep.subr.mxu1 %v5414_v0  ;;  %vm5868_vm14 = vcmp.eq.s32.totalorder %v248_v10, %v5657_v32 }
 0x1da   :  { %4963 = vmatpush3.msk.msra.mxu1 %vm5671_vm2, %v5415_v38  ;;  %5009 = vmatpush3.msk.msra.mxu0 %vm5868_vm14, %v5415_v38 }
 0x1db   :  { %4964 = vmatprep.subr.mxu1 %v5414_v0  ;;  %5010 = vmatprep.subr.mxu0 %v5414_v0 }
 0x1dc   :  { %4965 = vmatpush3.msk.msra.mxu1 %vm5681_vm3, %v5415_v38 }
 0x1dd   :  { %4966 = vmatprep.subr.mxu1 %v5414_v0 }
 0x1de   :  { %4967 = vmatpush3.msk.msra.mxu1 %vm5693_vm4, %v5415_v38 }
 0x1df   :  { %4968 = vmatprep.subr.mxu1 %v5414_v0 }
 0x1e0   :  { %4969 = vmatpush3.msk.msra.mxu1 %vm5706_vm5, %v5415_v38 }
 0x1e1   :  { %4970 = vmatprep.subr.mxu1 %v5414_v0 }
 0x1e2   :  { %4971 = vmatpush3.msk.msra.mxu1 %vm5719_vm6, %v5415_v38 }
 0x1e3   :  { %4972 = vmatprep.subr.mxu1 %v5414_v0 }
 0x1e4   :  { %4973 = vmatpush3.msk.msra.mxu1 %vm5729_vm7, %v5415_v38  ;;  %vm6702_vm7 = vcmask 1043456  }
 0x1e5   :  { %4974 = vmatprep.subr.mxu1 %v5414_v0 }
 0x1e6   :  { %4975 = vmatpush3.msk.msra.mxu1 %vm5741_vm9, %v5415_v38 }
 0x1e7   :  { %4979 = vmatprep.subr.mxu1 %v5414_v0 }
 0x297   :  { %v567_v12 = vpop.f32.mrf.mxu1 }
 0x298   :  { %v574_v13 = vrot.slane %v567_v12, %v5802_v11  ;;  %v241_v12 = vand.u32 3, %v5699_v47  ;;  %v227_v47 = vand.u32 3, %v5654_v30 }
 0x299   :  { %v4959_v14 = vpop.f32.mrf.mxu1 }
 0x29a   :  { %v575_v15 = vsub.f32 %v403_v56, %v574_v13  ;;  %v576_v16 = vsub.f32 %v408_v58, %v574_v13  ;;  %v830_v56 = vld [vmem:[%s6678_s3 + $0x8] sm:$0xff]  ;;  %v234_v13 = vand.u32 3, %v5712_v50  ;;  %v6680_v14 = vmov 0 }
 0x29b   :  { %v6681_v14 = vsel %vm5868_vm14, 4294967295, %v6680_v14  ;;  %vm5877_vm15 = vcmp.eq.s32.totalorder %v241_v12, %v5657_v32  ;;  %v6686_v50 = vmov 0 }
 0x29c   :  { %v577_v17 = vmul.f32 %v575_v15, %v575_v15  ;;  %v578_v18 = vmul.f32 %v576_v16, %v576_v16  ;;  %5011 = vmatpush3.msk.msra.mxu0 %vm5877_vm15, %v5415_v38 }
 0x29d   :  { %5012 = vmatprep.subr.mxu0 %v5414_v0 }
 0x29e   :  { %v579_v19 = vsel %vm6624_vm0, %v577_v17, 0.0  ;;  %v580_v20 = vsel %vm6624_vm0, %v578_v18, 0.0 }
 0x29f   :  { %v581_v21 = vadd.f32 %v580_v20, %v579_v19 }
 0x2a1   :  { %v582_v22 = vrot.slane %v581_v21, 4 }
 0x2a3   :  { %v583_v23 = vadd.f32 %v582_v22, %v581_v21 }
 0x2a5   :  { %v584_v24 = vrot.slane %v583_v23, 2 }
 0x2a7   :  { %v585_v25 = vadd.f32 %v584_v24, %v583_v23 }
 0x2a9   :  { %v586_v26 = vrot.slane %v585_v25, 1 }
 0x2ab   :  { %v587_v27 = vadd.f32 %v586_v26, %v585_v25 }
 0x2ad   :  { %4977 = vmatmul.mubr.msk.f32.vlgmr.msra.gmra.mxu1 %vm6624_vm0, %v587_v27  ;;  %v287_v27 = vand.u32 3, %v5657_v32 }
 0x2ae   :  { %4980 = vmatpush3.msk.msra.mxu1 %vm5758_vm10, %v5415_v38  ;;  %4981 = vmatprep.mubr.msk.f32.mxu1 %vm6628_vm8, %v5414_v0 }
 0x2af   :  { %4984 = vmatprep.subr.mxu1 %v5414_v0 }
 0x36d   :  { %v657_v28 = vpop.f32.mrf.mxu1 }
 0x36e   :  { %v661_v29 = vmul.f32 0.0078125, %v657_v28 }
 0x36f   :  { %v4978_v31 = vpop.f32.mrf.mxu1 }
 0x370   :  { %v662_v33 = vadd.f32 1e-05, %v661_v29 }
 0x372   :  { %5400 = vrsqrt.f32 %v662_v33 }
 0x37f   :  { %v5401_v36 = vpop.eup %5400 }
 0x380   :  { %v664_v37 = vmul.f32 %v5401_v36, %v412_v34 }
 0x382   :  { %4982 = vmatmul.mubr.msk.f32.vlgmr.msra.gmra.mxu1 %vm6623_vm11, %v664_v37 }
 0x383   :  { %4985 = vmatpush3.msk.msra.mxu1 %vm5758_vm10, %v5415_v38  ;;  %4986 = vmatprep.mubr.msk.f32.mxu1 %vm6628_vm8, %v5414_v0  ;;  %vm6630_vm10 = vcmask 1043456  }
 0x384   :  { %4989 = vmatprep.subr.mxu1 %v836_v40 }
 0x386   :  { %4987 = vmatmul.mubr.msk.f32.vlgmr.msra.gmra.mxu1 %vm6623_vm11, %v413_v41  ;;  %vm6627_vm11 = vcmask 261120  }
 0x387   :  { %4990 = vmatpush3.msra.mxu1 %v836_v40 }
 0x388   :  { %4991 = vmatprep.subr.mxu1 %v835_v43 }
 0x389   :  { %4992 = vmatpush3.msra.mxu1 %v835_v43 }
 0x38a   :  { %4993 = vmatprep.subr.mxu1 %v834_v46 }
 0x38b   :  { %4994 = vmatpush3.msra.mxu1 %v834_v46 }
 0x38c   :  { %4995 = vmatprep.subr.mxu1 %v833_v49 }
 0x38d   :  { %4996 = vmatpush3.msra.mxu1 %v833_v49 }
 0x38e   :  { %4997 = vmatprep.subr.mxu1 %v832_v52 }
 0x38f   :  { %4998 = vmatpush3.msra.mxu1 %v832_v52 }
 0x390   :  { %4999 = vmatprep.subr.mxu1 %v831_v54 }
 0x391   :  { %5000 = vmatpush3.msra.mxu1 %v831_v54 }
 0x392   :  { %5001 = vmatprep.subr.mxu1 %v830_v56 }
 0x393   :  { %5002 = vmatpush3.msra.mxu1 %v830_v56 }
 0x394   :  { %5003 = vmatprep.subr.mxu1 %v829_v57 }
 0x395   :  { %5004 = vmatpush3.msra.mxu1 %v829_v57 }
 0x396   :  { %5035 = vmatprep.subr.mxu1 %v5414_v0 }
 0x442   :  { %v734_v58 = vpop.f32.mrf.mxu1 }
 0x443   :  { %v814_v59 = vrot.slane %v734_v58, %v5802_v11 }
 0x444   :  { %v4983_v60 = vpop.f32.mrf.mxu1 }
 0x445   :  { %v815_v62 = vmul.f32 %v814_v59, %v575_v15  ;;  %v816_v63 = vmul.f32 %v814_v59, %v576_v16  ;;  %v6682_v15 = vmov 0 }
 0x446   :  { %v807_v61 = vpop.f32.mrf.mxu1  ;;  %v6683_v15 = vsel %vm5877_vm15, 4294967295, %v6682_v15 }
 0x447   :  { %v820_v1 = vrot.slane %v807_v61, %v5802_v11 }
 0x448   :  { %v4988_v2 = vpop.f32.mrf.mxu1 }
 0x449   :  { %v821_v3 = vadd.f32 %v820_v1, %v815_v62  ;;  %v822_v4 = vadd.f32 %v820_v1, %v816_v63  ;;  %v918_v1 = vld [vmem:[%s6691_s5] sm:$0x1] }
 0x44b   :  { %vm824_vm12 = vcmp.gt.f32.partialorder %v822_v4, 0.0  ;;  %v825_v5 = vmul.f32 0.1, %v821_v3  ;;  %v826_v6 = vmul.f32 0.1, %v822_v4  ;;  %vm823_vm13 = vcmp.gt.f32.partialorder %v821_v3, 0.0 }
 0x44d   :  { %v5854_v8 = vsel %vm823_vm13, %v821_v3, %v825_v5  ;;  %v5856_v9 = vsel %vm824_vm12, %v822_v4, %v826_v6  ;;  %vm5886_vm12 = vcmp.eq.s32.totalorder %v234_v13, %v5657_v32  ;;  %vm5896_vm13 = vcmp.eq.s32.totalorder %v227_v47, %v5657_v32  ;;  %v919_v4 = vld [vmem:[%s6694_s28] sm:$0x1] }
 0x44e   :  { %5005 = vmatprep.mubr.msk.f32.mxu1 %vm6624_vm0, %v5854_v8  ;;  %v6685_v44 = vsel %vm5886_vm12, 4294967295, %v6684_v44  ;;  %5013 = vmatpush3.msk.msra.mxu0 %vm5886_vm12, %v5415_v38  ;;  %v6687_v50 = vsel %vm5896_vm13, 4294967295, %v6686_v50  ;;  %v5957_v5 = vld [vmem:[%s6695_s7] sm:$0xff] }
 0x44f   :  { %5006 = vmatmul.mubr.msk.f32.vlgmr.msra.gmra.mxu1 %vm6624_vm0, %v5856_v9  ;;  %5014 = vmatprep.subr.mxu0 %v5414_v0  ;;  %vm295_vm0 = vcmp.eq.s32.totalorder %v287_v27, %v5654_v30  ;;  %v5962_v6 = vld [vmem:[%s6696_s29] sm:$0xff]  ;;  %v5978_v27 = vld [vmem:[%s6696_s29 + $0x8] sm:$0xff] }
 0x450   :  { %5037 = vmatprep.mubr.msk.f32.mxu1 %vm6628_vm8, %v5414_v0  ;;  %5015 = vmatpush3.msk.msra.mxu0 %vm5896_vm13, %v5415_v38  ;;  %v5912_v28 = vsel %vm295_vm0, 1.0, %v5414_v0  ;;  %vm6688_vm0 = vcmask 261120  }
 0x451   :  { %5019 = vmatprep.subr.mxu0 %v5414_v0  ;;  %5036 = vmatpush3.msk.msra.mxu1 %vm6630_vm10, %v5912_v28 }
 0x452   :  { %5040 = vmatprep.subr.mxu1 %v5414_v0 }
 0x50f   :  { %v5007_v16 = vpop.f32.mrf.mxu1 }
 0x510   :  { %v922_v18 = vsel %vm6627_vm11, %v5007_v16, 0.0 }
 0x511   :  { %v909_v17 = vpop.f32.mrf.mxu1 }
 0x512   :  { %v921_v19 = vsel %vm6627_vm11, %v909_v17, 0.0 }
 0x513   :  { %v923_v20 = vadd.f32 %v922_v18, %v921_v19 }
 0x515   :  { %v924_v21 = vrot.slane %v923_v20, 4 }
 0x517   :  { %v925_v22 = vadd.f32 %v924_v21, %v923_v20 }
 0x519   :  { %v926_v23 = vrot.slane %v925_v22, 2 }
 0x51b   :  { %v927_v24 = vadd.f32 %v926_v23, %v925_v22 }
 0x51d   :  { %v928_v25 = vrot.slane %v927_v24, 1 }
 0x51f   :  { %v929_v26 = vadd.f32 %v928_v25, %v927_v24 }
 0x521   :  { %5017 = vmatmul.mubr.msk.f32.vlgmr.msra.gmra.mxu0 %vm6627_vm11, %v929_v26  ;;  %vm6631_vm11 = vcmask 31744   ;;  %v5973_v26 = vld [vmem:[%s6695_s7 + $0x8] sm:$0xff] }
 0x522   :  { %5021 = vmatprep.mubr.msk.f32.mxu0 %vm6628_vm8, %v5414_v0  ;;  %5020 = vmatpush3.msk.msra.mxu0 %vm6630_vm10, %v5912_v28  ;;  %vm6690_vm10 = vmmov %vm6688_vm0 }
 0x523   :  { %5024 = vmatprep.subr.mxu0 %v5414_v0 }
 0x5e1   :  { %v999_v29 = vpop.f32.mrf.mxu0 }
 0x5e2   :  { %v1003_v31 = vmul.f32 0.0078125, %v999_v29  ;;  %v4585_v29 = vld [vmem:[%s6602_s9 + $0x38] sm:$0xff] }
 0x5e3   :  { %v5018_v32 = vpop.f32.mrf.mxu0 }
 0x5e4   :  { %5022 = vmatmul.mubr.msk.f32.vlgmr.msra.gmra.mxu0 %vm6631_vm11, %v1003_v31  ;;  %v1506_v31 = vld [vmem:[%s6602_s9 + $0x18] sm:$0xff]  ;;  %v4584_v32 = vld [vmem:[%s6602_s9 + $0x30] sm:$0xff] }
 0x5e5   :  { %5025 = vmatpush3.msk.msra.mxu0 %vm5868_vm14, %v5415_v38  ;;  %5032 = vmatprep.mubr.msk.f32.mxu0 %vm6628_vm8, %v5414_v0  ;;  %vm6689_vm8 = vmmov %vm6688_vm0 }
 0x5e6   :  { %5026 = vmatprep.subr.mxu0 %v5414_v0 }
 0x5e7   :  { %5027 = vmatpush3.msk.msra.mxu0 %vm5877_vm15, %v5415_v38 }
 0x5e8   :  { %5028 = vmatprep.subr.mxu0 %v5414_v0 }
 0x5e9   :  { %5029 = vmatpush3.msk.msra.mxu0 %vm5886_vm12, %v5415_v38 }
 0x5ea   :  { %5030 = vmatprep.subr.mxu0 %v5414_v0 }
 0x5eb   :  { %5031 = vmatpush3.msk.msra.mxu0 %vm5896_vm13, %v5415_v38 }
 0x6a4   :  { %v1078_v30 = vpop.f32.mrf.mxu0 }
 0x6a5   :  { %v1085_v33 = vrot.slane %v1078_v30, %v5802_v11  ;;  %v1505_v30 = vld [vmem:[%s6602_s9 + $0x10] sm:$0xff] }
 0x6a6   :  { %v5023_v34 = vpop.f32.mrf.mxu0 }
 0x6a7   :  { %v1086_v36 = vsub.f32 %v909_v17, %v1085_v33  ;;  %v1087_v37 = vsub.f32 %v5007_v16, %v1085_v33  ;;  %v4583_v33 = vld [vmem:[%s6602_s9 + $0x28] sm:$0xff]  ;;  %v4582_v34 = vld [vmem:[%s6602_s9 + $0x20] sm:$0xff] }
 0x6a9   :  { %v1088_v40 = vmul.f32 %v1086_v36, %v1086_v36  ;;  %v1089_v41 = vmul.f32 %v1087_v37, %v1087_v37 }
 0x6ab   :  { %v1090_v43 = vsel %vm6688_vm0, %v1088_v40, 0.0  ;;  %v1091_v46 = vsel %vm6689_vm8, %v1089_v41, 0.0  ;;  %vm6692_vm8 = vcmask 1043456   ;;  %vm6693_vm0 = vmmov 0   ;;  %v1504_v40 = vld [vmem:[%s6602_s9 + $0x8] sm:$0xff] }
 0x6ac   :  { %v1092_v49 = vadd.f32 %v1091_v46, %v1090_v43  ;;  %v4591_v41 = vld [vmem:[%s6602_s9 + $0x48] sm:$0xff]  ;;  %v1503_v43 = vld [vmem:[%s6602_s9] sm:$0xff] }
 0x6ad   :  { %v4590_v46 = vld [vmem:[%s6602_s9 + $0x40] sm:$0xff] }
 0x6ae   :  { %v1093_v52 = vrot.slane %v1092_v49, 4 }
 0x6b0   :  { %v1094_v54 = vadd.f32 %v1093_v52, %v1092_v49 }
 0x6b2   :  { %v1095_v56 = vrot.slane %v1094_v54, 2 }
 0x6b4   :  { %v1096_v57 = vadd.f32 %v1095_v56, %v1094_v54 }
 0x6b6   :  { %v1097_v58 = vrot.slane %v1096_v57, 1 }
 0x6b8   :  { %v1098_v59 = vadd.f32 %v1097_v58, %v1096_v57 }
 0x6ba   :  { %5033 = vmatmul.mubr.msk.f32.vlgmr.msra.gmra.mxu0 %vm6690_vm10, %v1098_v59  ;;  %vm6632_vm10 = vcmask 130048  }
 0x6bb   :  { %5049 = vmatprep.mubr.msk.f32.mxu0 %vm6632_vm10, %v5957_v5 }
 0x77a   :  { %v1168_v60 = vpop.f32.mrf.mxu0 }
 0x77b   :  { %v1172_v61 = vmul.f32 0.0078125, %v1168_v60 }
 0x77c   :  { %v5034_v62 = vpop.f32.mrf.mxu0 }
 0x77d   :  { %v1173_v63 = vadd.f32 1e-05, %v1172_v61 }
 0x77f   :  { %5402 = vrsqrt.f32 %v1173_v63 }
 0x78c   :  { %v5403_v2 = vpop.eup %5402 }
 0x78d   :  { %v1175_v3 = vmul.f32 %v5403_v2, %v918_v1 }
 0x78f   :  { %5038 = vmatmul.mubr.msk.f32.vlgmr.msra.gmra.mxu1 %vm6631_vm11, %v1175_v3 }
 0x790   :  { %5041 = vmatpush3.msk.msra.mxu1 %vm6692_vm8, %v5912_v28  ;;  %5042 = vmatprep.mubr.msk.f32.mxu1 %vm6693_vm0, %v5414_v0 }
 0x793   :  { %5043 = vmatmul.mubr.msk.f32.vlgmr.msra.gmra.mxu1 %vm6631_vm11, %v919_v4 }
 0x794   :  { %5056 = vmatprep.mubr.msk.f32.mxu1 %vm6632_vm10, %v5962_v6 }
 0x84f   :  { %v1245_v10 = vpop.f32.mrf.mxu1 }
 0x850   :  { %v1325_v12 = vrot.slane %v1245_v10, %v5802_v11 }
 0x851   :  { %v5039_v13 = vpop.f32.mrf.mxu1 }
 0x852   :  { %v1326_v16 = vmul.f32 %v1325_v12, %v1086_v36  ;;  %v1327_v17 = vmul.f32 %v1325_v12, %v1087_v37  ;;  %v4593_v36 = vld [vmem:[%s6602_s9 + $0x58] sm:$0xff]  ;;  %v4592_v37 = vld [vmem:[%s6602_s9 + $0x50] sm:$0xff] }
 0x853   :  { %v1318_v47 = vpop.f32.mrf.mxu1 }
 0x854   :  { %v1331_v18 = vrot.slane %v1318_v47, %v5802_v11 }
 0x855   :  { %v5044_v19 = vpop.f32.mrf.mxu1 }
 0x856   :  { %v1332_v20 = vadd.f32 %v1331_v18, %v1326_v16  ;;  %v1333_v21 = vadd.f32 %v1331_v18, %v1327_v17 }
 0x858   :  { %vm1335_vm8 = vcmp.gt.f32.partialorder %v1333_v21, 0.0  ;;  %v1336_v22 = vmul.f32 0.1, %v1332_v20  ;;  %v1337_v23 = vmul.f32 0.1, %v1333_v21  ;;  %vm1334_vm11 = vcmp.gt.f32.partialorder %v1332_v20, 0.0 }
 0x85a   :  { %v1339_v24 = vsel %vm1335_vm8, %v1333_v21, %v1337_v23  ;;  %v1338_v25 = vsel %vm1334_vm11, %v1332_v20, %v1336_v22  ;;  %vm6697_vm11 = vcmask 261120  }
 0x85b   :  { %5045 = vmatprep.subr.mxu0 %v1339_v24  ;;  %5052 = vmatprep.subr.mxu1 %v1339_v24  ;;  %vm6698_vm8 = vmmov %vm6697_vm11 }
 0x85c   :  { %5046 = vmatpush3.msra.mxu0 %v1339_v24  ;;  %5053 = vmatpush3.msra.mxu1 %v1339_v24  ;;  %vm6701_vm9 = vmmov %vm6698_vm8 }
 0x85d   :  { %5047 = vmatprep.subr.mxu0 %v1338_v25  ;;  %5054 = vmatprep.subr.mxu1 %v1338_v25 }
 0x85e   :  { %5048 = vmatpush3.msra.mxu0 %v1338_v25  ;;  %5055 = vmatpush3.msra.mxu1 %v1338_v25 }
 0x85f   :  { %5050 = vmatmul.mubr.msk.f32.vlgmr.msra.gmra.mxu0 %vm6632_vm10, %v5973_v26  ;;  %5057 = vmatmul.mubr.msk.f32.vlgmr.msra.gmra.mxu1 %vm6632_vm10, %v5978_v27  ;;  %vm6700_vm10 = vmmov %vm6698_vm8 }
 0x860   :  { %5059 = vmatprep.subr.mxu0 %v4585_v29  ;;  %5067 = vmatprep.mubr.msk.f32.mxu0 %vm6697_vm11, %v1338_v25  ;;  %vm6699_vm11 = vmmov %vm6698_vm8 }
 0x861   :  { %5060 = vmatpush3.msra.mxu0 %v4585_v29  ;;  %5070 = vmatprep.subr.mxu1 %v1506_v31 }
 0x862   :  { %5061 = vmatprep.subr.mxu0 %v4584_v32  ;;  %5071 = vmatpush3.msra.mxu1 %v1506_v31 }
 0x863   :  { %5062 = vmatpush3.msra.mxu0 %v4584_v32  ;;  %5072 = vmatprep.subr.mxu1 %v1505_v30 }
 0x864   :  { %5063 = vmatprep.subr.mxu0 %v4583_v33  ;;  %5073 = vmatpush3.msra.mxu1 %v1505_v30 }
 0x865   :  { %5064 = vmatpush3.msra.mxu0 %v4583_v33  ;;  %5074 = vmatprep.subr.mxu1 %v1504_v40 }
 0x866   :  { %5065 = vmatprep.subr.mxu0 %v4582_v34  ;;  %5075 = vmatpush3.msra.mxu1 %v1504_v40 }
 0x867   :  { %5066 = vmatpush3.msra.mxu0 %v4582_v34  ;;  %5076 = vmatprep.subr.mxu1 %v1503_v43 }
 0x868   :  { %5068 = vmatmul.mubr.msk.f32.vlgmr.msra.gmra.mxu0 %vm6698_vm8, %v1339_v24  ;;  %5081 = vmatprep.subr.mxu0 %v4593_v36 }
 0x869   :  { %5082 = vmatpush3.msra.mxu0 %v4593_v36  ;;  %5077 = vmatpush3.msra.mxu1 %v1503_v43 }
 0x86a   :  { %5083 = vmatprep.subr.mxu0 %v4592_v37  ;;  %5092 = vmatprep.subr.mxu1 %v5414_v0 }
 0x86b   :  { %5084 = vmatpush3.msra.mxu0 %v4592_v37 }
 0x86c   :  { %5085 = vmatprep.subr.mxu0 %v4591_v41 }
 0x86d   :  { %5086 = vmatpush3.msra.mxu0 %v4591_v41 }
 0x86e   :  { %5087 = vmatprep.subr.mxu0 %v4590_v46 }
 0x86f   :  { %5088 = vmatpush3.msra.mxu0 %v4590_v46 }
 0x870   :  { %5103 = vmatprep.subr.mxu0 %v5414_v0 }
 0x91f   :  { %v5051_v49 = vpop.f32.mrf.mxu0  ;;  %v5058_v52 = vpop.f32.mrf.mxu1 }
 0x921   :  { %v1413_v54 = vpop.f32.mrf.mxu0  ;;  %v1494_v56 = vpop.f32.mrf.mxu1 }
 0x922   :  { %5078 = vmatprep.mubr.msk.f32.mxu1 %vm6699_vm11, %v1413_v54  ;;  %5089 = vmatprep.mubr.msk.f32.mxu0 %vm6698_vm8, %v1494_v56  ;;  %vm6706_vm11 = vcmask 31744  }
 0x923   :  { %5079 = vmatmul.mubr.msk.f32.vlgmr.msra.gmra.mxu1 %vm6700_vm10, %v5051_v49  ;;  %5090 = vmatmul.mubr.msk.f32.vlgmr.msra.gmra.mxu0 %vm6701_vm9, %v5058_v52 }
 0x924   :  { %5093 = vmatpush3.msk.msra.mxu1 %vm5868_vm14, %v5415_v38  ;;  %5100 = vmatprep.mubr.msk.f32.mxu1 %vm6693_vm0, %v5414_v0 }
 0x925   :  { %5094 = vmatprep.subr.mxu1 %v5414_v0  ;;  %5104 = vmatpush3.msk.msra.mxu0 %vm6702_vm7, %v5912_v28  ;;  %vm6703_vm7 = vmmov %vm6698_vm8  ;;  %vm6707_vm8 = vcmask 1043456  }
 0x926   :  { %5095 = vmatpush3.msk.msra.mxu1 %vm5877_vm15, %v5415_v38  ;;  %5105 = vmatprep.mubr.msk.f32.mxu0 %vm6693_vm0, %v5414_v0  ;;  %vm6704_vm9 = vmmov %vm6703_vm7 }
 0x927   :  { %5096 = vmatprep.subr.mxu1 %v5414_v0  ;;  %5119 = vmatprep.subr.mxu0 %v5414_v0  ;;  %vm6705_vm10 = vmmov %vm6703_vm7 }
 0x928   :  { %5097 = vmatpush3.msk.msra.mxu1 %vm5886_vm12, %v5415_v38  ;;  %v5069_v57 = vpop.f32.mrf.mxu0 }
 0x929   :  { %5098 = vmatprep.subr.mxu1 %v5414_v0 }
 0x92a   :  { %5099 = vmatpush3.msk.msra.mxu1 %vm5896_vm13, %v5415_v38  ;;  %v1584_v58 = vpop.f32.mrf.mxu0 }
 0x92b   :  { %5108 = vmatprep.subr.mxu1 %v5414_v0 }
 0x9e3   :  { %v5080_v59 = vpop.f32.mrf.mxu1  ;;  %v5091_v60 = vpop.f32.mrf.mxu0 }
 0x9e4   :  { %v1671_v61 = vadd.f32 %v5080_v59, %v5069_v57 }
 0x9e5   :  { %v1665_v62 = vpop.f32.mrf.mxu1  ;;  %v1751_v2 = vpop.f32.mrf.mxu0 }
 0x9e6   :  { %v1761_v63 = vadd.f32 %v5091_v60, %v1671_v61  ;;  %v1666_v1 = vadd.f32 %v1665_v62, %v1584_v58  ;;  %v1762_v58 = vld [vmem:[%s6603_s10] sm:$0x1]  ;;  %v2181_v62 = vld [vmem:[%s6605_s12 + $0x18] sm:$0xff] }
 0x9e7   :  { %v1763_v61 = vld [vmem:[%s6604_s11] sm:$0x1] }
 0x9e8   :  { %v1760_v3 = vadd.f32 %v1751_v2, %v1666_v1  ;;  %v1765_v4 = vsel %vm6703_vm7, %v1761_v63, 0.0  ;;  %v2179_v1 = vld [vmem:[%s6605_s12 + $0x8] sm:$0xff]  ;;  %v2178_v2 = vld [vmem:[%s6605_s12] sm:$0xff] }
 0x9ea   :  { %v1764_v10 = vsel %vm6704_vm9, %v1760_v3, 0.0  ;;  %vm6708_vm9 = vmmov %vm6703_vm7 }
 0x9eb   :  { %v1766_v12 = vadd.f32 %v1765_v4, %v1764_v10 }
 0x9ed   :  { %v1767_v13 = vrot.slane %v1766_v12, 4 }
 0x9ef   :  { %v1768_v47 = vadd.f32 %v1767_v13, %v1766_v12 }
 0x9f1   :  { %v1769_v16 = vrot.slane %v1768_v47, 2 }
 0x9f3   :  { %v1770_v17 = vadd.f32 %v1769_v16, %v1768_v47 }
 0x9f5   :  { %v1771_v18 = vrot.slane %v1770_v17, 1 }
 0x9f7   :  { %v1772_v19 = vadd.f32 %v1771_v18, %v1770_v17 }
 0x9f9   :  { %5101 = vmatmul.mubr.msk.f32.vlgmr.msra.gmra.mxu1 %vm6705_vm10, %v1772_v19  ;;  %vm6709_vm10 = vmmov %vm6703_vm7 }
 0x9fa   :  { %5109 = vmatpush3.msk.msra.mxu1 %vm5868_vm14, %v5415_v38  ;;  %5116 = vmatprep.mubr.msk.f32.mxu1 %vm6693_vm0, %v5414_v0 }
 0x9fb   :  { %5110 = vmatprep.subr.mxu1 %v5414_v0 }
 0x9fc   :  { %5111 = vmatpush3.msk.msra.mxu1 %vm5877_vm15, %v5415_v38  ;;  %vm6716_vm15 = vcmask 523264  }
 0x9fd   :  { %5112 = vmatprep.subr.mxu1 %v5414_v0  ;;  %vm6717_vm14 = vmmov %vm6716_vm15 }
 0x9fe   :  { %5113 = vmatpush3.msk.msra.mxu1 %vm5886_vm12, %v5415_v38  ;;  %vm6715_vm12 = vnez %v6676_v7 }
 0x9ff   :  { %5114 = vmatprep.subr.mxu1 %v5414_v0 }
 0xa00   :  { %5115 = vmatpush3.msk.msra.mxu1 %vm5896_vm13, %v5415_v38 }
 0xa01   :  { %5129 = vmatprep.subr.mxu1 %v2181_v62 }
 0xab9   :  { %v1842_v20 = vpop.f32.mrf.mxu1 }
 0xaba   :  { %v1846_v21 = vmul.f32 0.0078125, %v1842_v20 }
 0xabb   :  { %v5102_v22 = vpop.f32.mrf.mxu1 }
 0xabc   :  { %5106 = vmatmul.mubr.msk.f32.vlgmr.msra.gmra.mxu0 %vm6706_vm11, %v1846_v21 }
 0xabd   :  { %5120 = vmatpush3.msk.msra.mxu0 %vm6707_vm8, %v5912_v28  ;;  %5121 = vmatprep.mubr.msk.f32.mxu0 %vm6693_vm0, %v5414_v0 }
 0xabe   :  { %5124 = vmatprep.subr.mxu0 %v5414_v0 }
 0xb7c   :  { %v1916_v23 = vpop.f32.mrf.mxu0 }
 0xb7d   :  { %v1923_v24 = vrot.slane %v1916_v23, %v5802_v11 }
 0xb7e   :  { %v5107_v25 = vpop.f32.mrf.mxu0 }
 0xb7f   :  { %v6078_v29 = vsub.f32 %v1760_v3, %v1923_v24  ;;  %v6080_v31 = vsub.f32 %v1761_v63, %v1923_v24  ;;  %v2180_v63 = vld [vmem:[%s6605_s12 + $0x10] sm:$0xff] }
 0xb81   :  { %v1926_v32 = vmul.f32 %v6078_v29, %v6078_v29  ;;  %v1927_v30 = vmul.f32 %v6080_v31, %v6080_v31 }
 0xb83   :  { %v1928_v33 = vsel %vm6703_vm7, %v1926_v32, 0.0  ;;  %v1929_v34 = vsel %vm6708_vm9, %v1927_v30, 0.0  ;;  %vm6710_vm7 = vmmov %vm6706_vm11  ;;  %vm6711_vm9 = vnez %v6672_v53 }
 0xb84   :  { %v1930_v36 = vadd.f32 %v1929_v34, %v1928_v33 }
 0xb86   :  { %v1931_v37 = vrot.slane %v1930_v36, 4 }
 0xb88   :  { %v1932_v40 = vadd.f32 %v1931_v37, %v1930_v36 }
 0xb8a   :  { %v1933_v41 = vrot.slane %v1932_v40, 2 }
 0xb8c   :  { %v1934_v43 = vadd.f32 %v1933_v41, %v1932_v40 }
 0xb8e   :  { %v1935_v46 = vrot.slane %v1934_v43, 1 }
 0xb90   :  { %v1936_v49 = vadd.f32 %v1935_v46, %v1934_v43 }
 0xb92   :  { %5117 = vmatmul.mubr.msk.f32.vlgmr.msra.gmra.mxu1 %vm6709_vm10, %v1936_v49  ;;  %vm6712_vm10 = vnez %v6674_v55 }
 0xb93   :  { %5130 = vmatpush3.msra.mxu1 %v2181_v62 }
 0xb94   :  { %5131 = vmatprep.subr.mxu1 %v2180_v63 }
 0xb95   :  { %5132 = vmatpush3.msra.mxu1 %v2180_v63 }
 0xb96   :  { %5133 = vmatprep.subr.mxu1 %v2179_v1 }
 0xb97   :  { %5134 = vmatpush3.msra.mxu1 %v2179_v1 }
 0xb98   :  { %5135 = vmatprep.subr.mxu1 %v2178_v2 }
 0xb99   :  { %5136 = vmatpush3.msra.mxu1 %v2178_v2 }
 0xb9a   :  { %5159 = vmatprep.subr.mxu1 %v5414_v0 }
 0xc52   :  { %v2006_v52 = vpop.f32.mrf.mxu1 }
 0xc53   :  { %v2010_v54 = vmul.f32 0.0078125, %v2006_v52 }
 0xc54   :  { %v5118_v56 = vpop.f32.mrf.mxu1 }
 0xc55   :  { %v2011_v57 = vadd.f32 1e-05, %v2010_v54 }
 0xc57   :  { %5404 = vrsqrt.f32 %v2011_v57 }
 0xc64   :  { %v5405_v59 = vpop.eup %5404 }
 0xc65   :  { %v2013_v60 = vmul.f32 %v5405_v59, %v1762_v58 }
 0xc67   :  { %5122 = vmatmul.mubr.msk.f32.vlgmr.msra.gmra.mxu0 %vm6706_vm11, %v2013_v60 }
 0xc68   :  { %5125 = vmatpush3.msk.msra.mxu0 %vm6707_vm8, %v5912_v28  ;;  %5126 = vmatprep.mubr.msk.f32.mxu0 %vm6693_vm0, %v5414_v0 }
 0xc69   :  { %5140 = vmatprep.subr.mxu0 %v5414_v0 }
 0xc6b   :  { %5127 = vmatmul.mubr.msk.f32.vlgmr.msra.gmra.mxu0 %vm6710_vm7, %v1763_v61  ;;  %vm6713_vm7 = vcmask 261120  }
 0xc6c   :  { %5141 = vmatpush3.msk.msra.mxu0 %vm5661_vm1, %v5415_v38  ;;  %5156 = vmatprep.mubr.msk.f32.mxu0 %vm6693_vm0, %v5414_v0  ;;  %vm6714_vm13 = vmmov %vm6713_vm7 }
 0xc6d   :  { %5142 = vmatprep.subr.mxu0 %v5414_v0 }
 0xc6e   :  { %5143 = vmatpush3.msk.msra.mxu0 %vm5671_vm2, %v5415_v38 }
 0xc6f   :  { %5144 = vmatprep.subr.mxu0 %v5414_v0 }
 0xc70   :  { %5145 = vmatpush3.msk.msra.mxu0 %vm5681_vm3, %v5415_v38 }
 0xc71   :  { %5146 = vmatprep.subr.mxu0 %v5414_v0 }
 0xc72   :  { %5147 = vmatpush3.msk.msra.mxu0 %vm5693_vm4, %v5415_v38 }
 0xc73   :  { %5148 = vmatprep.subr.mxu0 %v5414_v0 }
 0xc74   :  { %5149 = vmatpush3.msk.msra.mxu0 %vm5706_vm5, %v5415_v38 }
 0xc75   :  { %5150 = vmatprep.subr.mxu0 %v5414_v0 }
 0xc76   :  { %5151 = vmatpush3.msk.msra.mxu0 %vm5719_vm6, %v5415_v38 }
 0xc77   :  { %5152 = vmatprep.subr.mxu0 %v5414_v0 }
 0xc78   :  { %5153 = vmatpush3.msk.msra.mxu0 %vm6711_vm9, %v5415_v38 }
 0xc79   :  { %5154 = vmatprep.subr.mxu0 %v5414_v0 }
 0xc7a   :  { %5155 = vmatpush3.msk.msra.mxu0 %vm6712_vm10, %v5415_v38 }
 0xc7b   :  { %5183 = vmatprep.subr.mxu0 %v5414_v0 }
 0xd27   :  { %v2083_v3 = vpop.f32.mrf.mxu0 }
 0xd28   :  { %v2163_v4 = vrot.slane %v2083_v3, %v5802_v11 }
 0xd29   :  { %v5123_v10 = vpop.f32.mrf.mxu0 }
 0xd2a   :  { %v2164_v13 = vmul.f32 %v2163_v4, %v6078_v29  ;;  %v2165_v47 = vmul.f32 %v2163_v4, %v6080_v31 }
 0xd2b   :  { %v2156_v12 = vpop.f32.mrf.mxu0 }
 0xd2c   :  { %v2169_v16 = vrot.slane %v2156_v12, %v5802_v11 }
 0xd2d   :  { %v5128_v17 = vpop.f32.mrf.mxu0 }
 0xd2e   :  { %v2170_v18 = vadd.f32 %v2169_v16, %v2164_v13  ;;  %v2171_v19 = vadd.f32 %v2169_v16, %v2165_v47  ;;  %v2263_v17 = vld [vmem:[%s6606_s13] sm:$0x1] }
 0xd30   :  { %vm2173_vm11 = vcmp.gt.f32.partialorder %v2171_v19, 0.0  ;;  %v2174_v20 = vmul.f32 0.1, %v2170_v18  ;;  %v2175_v21 = vmul.f32 0.1, %v2171_v19  ;;  %vm2172_vm8 = vcmp.gt.f32.partialorder %v2170_v18, 0.0 }
 0xd32   :  { %v2176_v22 = vsel %vm2172_vm8, %v2170_v18, %v2174_v20  ;;  %v2177_v23 = vsel %vm2173_vm11, %v2171_v19, %v2175_v21  ;;  %v2688_v20 = vld [vmem:[%s6607_s15 + $0x38] sm:$0xff]  ;;  %v2264_v21 = vld [vmem:[%s6608_s14] sm:$0x1] }
 0xd33   :  { %5137 = vmatprep.mubr.msk.f32.mxu1 %vm6713_vm7, %v2176_v22  ;;  %vm6723_vm7 = vnez %v6681_v14  ;;  %v2687_v22 = vld [vmem:[%s6607_s15 + $0x30] sm:$0xff] }
 0xd34   :  { %5138 = vmatmul.mubr.msk.f32.vlgmr.msra.gmra.mxu1 %vm6714_vm13, %v2177_v23  ;;  %vm6718_vm13 = vmmov %vm6717_vm14  ;;  %v2686_v23 = vld [vmem:[%s6607_s15 + $0x28] sm:$0xff] }
 0xd35   :  { %5160 = vmatpush3.msk.msra.mxu1 %vm6715_vm12, %v5415_v38  ;;  %5161 = vmatprep.mubr.msk.f32.mxu1 %vm6693_vm0, %v5414_v0  ;;  %vm6721_vm11 = vmmov %vm6718_vm13 }
 0xd36   :  { %5164 = vmatprep.subr.mxu1 %v5414_v0  ;;  %vm6722_vm8 = vmmov %vm6721_vm11 }
 0xdf4   :  { %v5139_v24 = vpop.f32.mrf.mxu1 }
 0xdf5   :  { %v2266_v29 = vsel %vm6716_vm15, %v5139_v24, 0.0  ;;  %vm6720_vm15 = vmmov %vm6718_vm13 }
 0xdf6   :  { %v2254_v25 = vpop.f32.mrf.mxu1 }
 0xdf7   :  { %v2265_v31 = vsel %vm6717_vm14, %v2254_v25, 0.0  ;;  %vm6719_vm14 = vcmask 64512  }
 0xdf8   :  { %v2267_v32 = vadd.f32 %v2266_v29, %v2265_v31  ;;  %v2683_v29 = vld [vmem:[%s6607_s15 + $0x10] sm:$0xff]  ;;  %v2682_v31 = vld [vmem:[%s6607_s15 + $0x8] sm:$0xff] }
 0xdfa   :  { %v2268_v30 = vrot.slane %v2267_v32, 4 }
 0xdfc   :  { %v2269_v33 = vadd.f32 %v2268_v30, %v2267_v32  ;;  %v2681_v32 = vld [vmem:[%s6607_s15] sm:$0xff] }
 0xdfe   :  { %v2270_v34 = vrot.slane %v2269_v33, 2 }
 0xe00   :  { %v2271_v36 = vadd.f32 %v2270_v34, %v2269_v33 }
 0xe02   :  { %v2272_v37 = vrot.slane %v2271_v36, 1 }
 0xe04   :  { %v2273_v40 = vadd.f32 %v2272_v37, %v2271_v36 }
 0xe06   :  { %5157 = vmatmul.mubr.msk.f32.vlgmr.msra.gmra.mxu0 %vm6718_vm13, %v2273_v40  ;;  %vm6724_vm13 = vnez %v6683_v15 }
 0xe07   :  { %5184 = vmatpush3.msk.msra.mxu0 %vm6715_vm12, %v5415_v38  ;;  %5185 = vmatprep.mubr.msk.f32.mxu0 %vm6693_vm0, %v5414_v0 }
 0xe08   :  { %5188 = vmatprep.subr.mxu0 %v5414_v0 }
 0xec6   :  { %v2343_v41 = vpop.f32.mrf.mxu0 }
 0xec7   :  { %v2347_v43 = vmul.f32 0.0078125, %v2343_v41 }
 0xec8   :  { %v5158_v46 = vpop.f32.mrf.mxu0 }
 0xec9   :  { %5162 = vmatmul.mubr.msk.f32.vlgmr.msra.gmra.mxu1 %vm6719_vm14, %v2347_v43  ;;  %vm6725_vm14 = vnez %v6685_v44 }
 0xeca   :  { %5165 = vmatpush3.msk.msra.mxu1 %vm5661_vm1, %v5415_v38  ;;  %5180 = vmatprep.mubr.msk.f32.mxu1 %vm6693_vm0, %v5414_v0 }
 0xecb   :  { %5166 = vmatprep.subr.mxu1 %v5414_v0 }
 0xecc   :  { %5167 = vmatpush3.msk.msra.mxu1 %vm5671_vm2, %v5415_v38 }
 0xecd   :  { %5168 = vmatprep.subr.mxu1 %v5414_v0 }
 0xece   :  { %5169 = vmatpush3.msk.msra.mxu1 %vm5681_vm3, %v5415_v38 }
 0xecf   :  { %5170 = vmatprep.subr.mxu1 %v5414_v0 }
 0xed0   :  { %5171 = vmatpush3.msk.msra.mxu1 %vm5693_vm4, %v5415_v38 }
 0xed1   :  { %5172 = vmatprep.subr.mxu1 %v5414_v0 }
 0xed2   :  { %5173 = vmatpush3.msk.msra.mxu1 %vm5706_vm5, %v5415_v38 }
 0xed3   :  { %5174 = vmatprep.subr.mxu1 %v5414_v0 }
 0xed4   :  { %5175 = vmatpush3.msk.msra.mxu1 %vm5719_vm6, %v5415_v38 }
 0xed5   :  { %5176 = vmatprep.subr.mxu1 %v5414_v0 }
 0xed6   :  { %5177 = vmatpush3.msk.msra.mxu1 %vm6711_vm9, %v5415_v38  ;;  %vm6731_vm9 = vcmask 1043456  }
 0xed7   :  { %5178 = vmatprep.subr.mxu1 %v5414_v0 }
 0xed8   :  { %5179 = vmatpush3.msk.msra.mxu1 %vm6712_vm10, %v5415_v38 }
 0xed9   :  { %5212 = vmatprep.subr.mxu1 %v5414_v0 }
 0xf89   :  { %v2417_v49 = vpop.f32.mrf.mxu1 }
 0xf8a   :  { %v2424_v52 = vrot.slane %v2417_v49, %v5802_v11 }
 0xf8b   :  { %v5163_v54 = vpop.f32.mrf.mxu1 }
 0xf8c   :  { %v6206_v56 = vsub.f32 %v2254_v25, %v2424_v52  ;;  %v6208_v57 = vsub.f32 %v5139_v24, %v2424_v52  ;;  %v2685_v24 = vld [vmem:[%s6607_s15 + $0x20] sm:$0xff]  ;;  %v2684_v25 = vld [vmem:[%s6607_s15 + $0x18] sm:$0xff] }
 0xf8e   :  { %v2427_v58 = vmul.f32 %v6206_v56, %v6206_v56  ;;  %v2428_v59 = vmul.f32 %v6208_v57, %v6208_v57 }
 0xf90   :  { %v2429_v60 = vsel %vm6720_vm15, %v2427_v58, 0.0  ;;  %v2430_v61 = vsel %vm6721_vm11, %v2428_v59, 0.0  ;;  %vm6726_vm15 = vnez %v6687_v50  ;;  %vm6727_vm11 = vcmask 64512  }
 0xf91   :  { %v2431_v62 = vadd.f32 %v2430_v61, %v2429_v60 }
 0xf93   :  { %v2432_v63 = vrot.slane %v2431_v62, 4 }
 0xf95   :  { %v2433_v1 = vadd.f32 %v2432_v63, %v2431_v62 }
 0xf97   :  { %v2434_v2 = vrot.slane %v2433_v1, 2 }
 0xf99   :  { %v2435_v3 = vadd.f32 %v2434_v2, %v2433_v1 }
 0xf9b   :  { %v2436_v4 = vrot.slane %v2435_v3, 1 }
 0xf9d   :  { %v2437_v10 = vadd.f32 %v2436_v4, %v2435_v3 }
 0xf9f   :  { %5181 = vmatmul.mubr.msk.f32.vlgmr.msra.gmra.mxu1 %vm6722_vm8, %v2437_v10  ;;  %vm6728_vm8 = vmmov %vm6727_vm11 }
 0xfa0   :  { %5213 = vmatpush3.msk.msra.mxu1 %vm6723_vm7, %v5415_v38  ;;  %5220 = vmatprep.mubr.msk.f32.mxu1 %vm6693_vm0, %v5414_v0 }
 0xfa1   :  { %5214 = vmatprep.subr.mxu1 %v5414_v0 }
 0xfa2   :  { %5215 = vmatpush3.msk.msra.mxu1 %vm6724_vm13, %v5415_v38 }
 0xfa3   :  { %5216 = vmatprep.subr.mxu1 %v5414_v0 }
 0xfa4   :  { %5217 = vmatpush3.msk.msra.mxu1 %vm6725_vm14, %v5415_v38 }
 0xfa5   :  { %5218 = vmatprep.subr.mxu1 %v5414_v0 }
 0xfa6   :  { %5219 = vmatpush3.msk.msra.mxu1 %vm6726_vm15, %v5415_v38 }
 0xfa7   :  { %5223 = vmatprep.subr.mxu1 %v5414_v0 }
0x105f   :  { %v2507_v12 = vpop.f32.mrf.mxu1 }
0x1060   :  { %v2511_v13 = vmul.f32 0.0078125, %v2507_v12 }
0x1061   :  { %v5182_v47 = vpop.f32.mrf.mxu1 }
0x1062   :  { %v2512_v16 = vadd.f32 1e-05, %v2511_v13 }
0x1064   :  { %5406 = vrsqrt.f32 %v2512_v16 }
0x1071   :  { %v5407_v18 = vpop.eup %5406 }
0x1072   :  { %v2514_v19 = vmul.f32 %v5407_v18, %v2263_v17 }
0x1074   :  { %5186 = vmatmul.mubr.msk.f32.vlgmr.msra.gmra.mxu0 %vm6727_vm11, %v2514_v19 }
0x1075   :  { %5189 = vmatpush3.msk.msra.mxu0 %vm6715_vm12, %v5415_v38  ;;  %5190 = vmatprep.mubr.msk.f32.mxu0 %vm6693_vm0, %v5414_v0  ;;  %vm6729_vm12 = vcmask 523264  }
0x1076   :  { %5193 = vmatprep.subr.mxu0 %v2688_v20  ;;  %vm6730_vm10 = vmmov %vm6729_vm12 }
0x1078   :  { %5191 = vmatmul.mubr.msk.f32.vlgmr.msra.gmra.mxu0 %vm6728_vm8, %v2264_v21 }
0x1079   :  { %5194 = vmatpush3.msra.mxu0 %v2688_v20 }
0x107a   :  { %5195 = vmatprep.subr.mxu0 %v2687_v22 }
0x107b   :  { %5196 = vmatpush3.msra.mxu0 %v2687_v22 }
0x107c   :  { %5197 = vmatprep.subr.mxu0 %v2686_v23 }
0x107d   :  { %5198 = vmatpush3.msra.mxu0 %v2686_v23 }
0x107e   :  { %5199 = vmatprep.subr.mxu0 %v2685_v24 }
0x107f   :  { %5200 = vmatpush3.msra.mxu0 %v2685_v24 }
0x1080   :  { %5201 = vmatprep.subr.mxu0 %v2684_v25 }
0x1081   :  { %5202 = vmatpush3.msra.mxu0 %v2684_v25 }
0x1082   :  { %5203 = vmatprep.subr.mxu0 %v2683_v29 }
0x1083   :  { %5204 = vmatpush3.msra.mxu0 %v2683_v29 }
0x1084   :  { %5205 = vmatprep.subr.mxu0 %v2682_v31 }
0x1085   :  { %5206 = vmatpush3.msra.mxu0 %v2682_v31 }
0x1086   :  { %5207 = vmatprep.subr.mxu0 %v2681_v32 }
0x1087   :  { %5208 = vmatpush3.msra.mxu0 %v2681_v32 }
0x1088   :  { %5239 = vmatprep.subr.mxu0 %v5414_v0 }
0x1134   :  { %v2584_v30 = vpop.f32.mrf.mxu0 }
0x1135   :  { %v2664_v33 = vrot.slane %v2584_v30, %v5802_v11 }
0x1136   :  { %v5187_v34 = vpop.f32.mrf.mxu0 }
0x1137   :  { %v2665_v37 = vmul.f32 %v2664_v33, %v6206_v56  ;;  %v2666_v40 = vmul.f32 %v2664_v33, %v6208_v57 }
0x1138   :  { %v2657_v36 = vpop.f32.mrf.mxu0 }
0x1139   :  { %v2670_v41 = vrot.slane %v2657_v36, %v5802_v11 }
0x113a   :  { %v5192_v43 = vpop.f32.mrf.mxu0 }
0x113b   :  { %v2671_v46 = vadd.f32 %v2670_v41, %v2665_v37  ;;  %v2672_v49 = vadd.f32 %v2670_v41, %v2666_v40  ;;  %v2770_v43 = vld [vmem:[%s6609_s16] sm:$0x1] }
0x113d   :  { %vm2673_vm11 = vcmp.gt.f32.partialorder %v2671_v46, 0.0  ;;  %vm2674_vm8 = vcmp.gt.f32.partialorder %v2672_v49, 0.0  ;;  %v2675_v52 = vmul.f32 0.1, %v2671_v46  ;;  %v2676_v54 = vmul.f32 0.1, %v2672_v49 }
0x113f   :  { %v2677_v58 = vsel %vm2673_vm11, %v2671_v46, %v2675_v52  ;;  %v2678_v59 = vsel %vm2674_vm8, %v2672_v49, %v2676_v54  ;;  %vm6732_vm11 = vcmask 261120  }
0x1140   :  { %v6278_v60 = vadd.f32 %v2678_v59, %v5856_v9  ;;  %v6281_v61 = vadd.f32 %v2677_v58, %v5854_v8  ;;  %vm6733_vm8 = vmmov %vm6732_vm11 }
0x1142   :  { %5209 = vmatprep.mubr.msk.f32.mxu0 %vm6729_vm12, %v6281_v61  ;;  %vm6734_vm12 = vmmov %vm6733_vm8 }
0x1143   :  { %5210 = vmatmul.mubr.msk.f32.vlgmr.msra.gmra.mxu0 %vm6730_vm10, %v6278_v60  ;;  %vm6735_vm10 = vcmask 31744  }
0x1144   :  { %5240 = vmatpush3.msk.msra.mxu0 %vm6731_vm9, %v5912_v28  ;;  %5241 = vmatprep.mubr.msk.f32.mxu0 %vm6693_vm0, %v5414_v0 }
0x1145   :  { %5244 = vmatprep.subr.mxu0 %v5414_v0 }
0x1203   :  { %v5211_v56 = vpop.f32.mrf.mxu0 }
0x1204   :  { %v2773_v57 = vsel %vm6732_vm11, %v5211_v56, 0.0  ;;  %vm6736_vm11 = vmmov %vm6733_vm8 }
0x1205   :  { %v2761_v9 = vpop.f32.mrf.mxu0 }
0x1206   :  { %v2772_v8 = vsel %vm6733_vm8, %v2761_v9, 0.0 }
0x1207   :  { %v2774_v62 = vadd.f32 %v2773_v57, %v2772_v8 }
0x1209   :  { %v2775_v63 = vrot.slane %v2774_v62, 4 }
0x120b   :  { %v2776_v1 = vadd.f32 %v2775_v63, %v2774_v62 }
0x120d   :  { %v2777_v2 = vrot.slane %v2776_v1, 2 }
0x120f   :  { %v2778_v3 = vadd.f32 %v2777_v2, %v2776_v1 }
0x1211   :  { %v2779_v4 = vrot.slane %v2778_v3, 1 }
0x1213   :  { %v2780_v10 = vadd.f32 %v2779_v4, %v2778_v3  ;;  %v4663_v4 = vld [vmem:[%s6611_s18 + $0x38] sm:$0xff] }
0x1215   :  { %5221 = vmatmul.mubr.msk.f32.vlgmr.msra.gmra.mxu1 %vm6734_vm12, %v2780_v10  ;;  %vm6737_vm12 = vmmov %vm6733_vm8  ;;  %v3339_v10 = vld [vmem:[%s6611_s18 + $0x18] sm:$0xff] }
0x1216   :  { %5224 = vmatpush3.msk.msra.mxu1 %vm6731_vm9, %v5912_v28  ;;  %5225 = vmatprep.mubr.msk.f32.mxu1 %vm6693_vm0, %v5414_v0  ;;  %vm6738_vm9 = vcmask 130048  }
0x1217   :  { %5228 = vmatprep.subr.mxu1 %v5414_v0 }
0x12d5   :  { %v2850_v12 = vpop.f32.mrf.mxu1 }
0x12d6   :  { %v2854_v13 = vmul.f32 0.0078125, %v2850_v12  ;;  %v4662_v12 = vld [vmem:[%s6611_s18 + $0x30] sm:$0xff] }
0x12d7   :  { %v5222_v47 = vpop.f32.mrf.mxu1 }
0x12d8   :  { %5226 = vmatmul.mubr.msk.f32.vlgmr.msra.gmra.mxu1 %vm6735_vm10, %v2854_v13  ;;  %v3338_v13 = vld [vmem:[%s6611_s18 + $0x10] sm:$0xff]  ;;  %v4661_v47 = vld [vmem:[%s6611_s18 + $0x28] sm:$0xff] }
0x12d9   :  { %5229 = vmatpush3.msk.msra.mxu1 %vm6723_vm7, %v5415_v38  ;;  %5236 = vmatprep.mubr.msk.f32.mxu1 %vm6693_vm0, %v5414_v0 }
0x12da   :  { %5230 = vmatprep.subr.mxu1 %v5414_v0 }
0x12db   :  { %5231 = vmatpush3.msk.msra.mxu1 %vm6724_vm13, %v5415_v38 }
0x12dc   :  { %5232 = vmatprep.subr.mxu1 %v5414_v0 }
0x12dd   :  { %5233 = vmatpush3.msk.msra.mxu1 %vm6725_vm14, %v5415_v38 }
0x12de   :  { %5234 = vmatprep.subr.mxu1 %v5414_v0 }
0x12df   :  { %5235 = vmatpush3.msk.msra.mxu1 %vm6726_vm15, %v5415_v38 }
0x1398   :  { %v2924_v16 = vpop.f32.mrf.mxu1 }
0x1399   :  { %v2931_v17 = vrot.slane %v2924_v16, %v5802_v11  ;;  %v4670_v16 = vld [vmem:[%s6611_s18 + $0x50] sm:$0xff] }
0x139a   :  { %v5227_v18 = vpop.f32.mrf.mxu1 }
0x139b   :  { %v2932_v19 = vsub.f32 %v2761_v9, %v2931_v17  ;;  %v2933_v20 = vsub.f32 %v5211_v56, %v2931_v17  ;;  %v3337_v17 = vld [vmem:[%s6611_s18 + $0x8] sm:$0xff] }
0x139c   :  { %v4669_v18 = vld [vmem:[%s6611_s18 + $0x48] sm:$0xff] }
0x139d   :  { %v2934_v21 = vmul.f32 %v2932_v19, %v2932_v19  ;;  %v2935_v22 = vmul.f32 %v2933_v20, %v2933_v20 }
0x139f   :  { %v2936_v23 = vsel %vm6736_vm11, %v2934_v21, 0.0  ;;  %v2937_v24 = vsel %vm6733_vm8, %v2935_v22, 0.0  ;;  %vm6739_vm11 = vcmask 1043456   ;;  %vm6740_vm8 = vmmov %vm6735_vm10 }
0x13a0   :  { %v2938_v25 = vadd.f32 %v2937_v24, %v2936_v23 }
0x13a2   :  { %v2939_v29 = vrot.slane %v2938_v25, 4 }
0x13a4   :  { %v2940_v31 = vadd.f32 %v2939_v29, %v2938_v25 }
0x13a6   :  { %v2941_v32 = vrot.slane %v2940_v31, 2 }
0x13a8   :  { %v2942_v30 = vadd.f32 %v2941_v32, %v2940_v31 }
0x13aa   :  { %v2943_v33 = vrot.slane %v2942_v30, 1 }
0x13ac   :  { %v2944_v34 = vadd.f32 %v2943_v33, %v2942_v30 }
0x13ae   :  { %5237 = vmatmul.mubr.msk.f32.vlgmr.msra.gmra.mxu1 %vm6737_vm12, %v2944_v34  ;;  %vm6741_vm12 = vmmov %vm6738_vm9 }
0x13af   :  { %5253 = vmatprep.mubr.msk.f32.mxu1 %vm6738_vm9, %v5957_v5  ;;  %v2771_v5 = vld [vmem:[%s6610_s17] sm:$0x1] }
0x146e   :  { %v3014_v36 = vpop.f32.mrf.mxu1 }
0x146f   :  { %v3018_v37 = vmul.f32 0.0078125, %v3014_v36 }
0x1470   :  { %v5238_v40 = vpop.f32.mrf.mxu1 }
0x1471   :  { %v3019_v41 = vadd.f32 1e-05, %v3018_v37 }
0x1473   :  { %5408 = vrsqrt.f32 %v3019_v41 }
0x1480   :  { %v5409_v46 = vpop.eup %5408 }
0x1481   :  { %v3021_v49 = vmul.f32 %v5409_v46, %v2770_v43 }
0x1483   :  { %5242 = vmatmul.mubr.msk.f32.vlgmr.msra.gmra.mxu0 %vm6735_vm10, %v3021_v49 }
0x1484   :  { %5245 = vmatpush3.msk.msra.mxu0 %vm6739_vm11, %v5912_v28  ;;  %5246 = vmatprep.mubr.msk.f32.mxu0 %vm6693_vm0, %v5414_v0  ;;  %vm6742_vm11 = vmmov %vm6741_vm12 }
0x1487   :  { %5247 = vmatmul.mubr.msk.f32.vlgmr.msra.gmra.mxu0 %vm6740_vm8, %v2771_v5  ;;  %vm6743_vm8 = vmmov %vm6742_vm11 }
0x1488   :  { %5260 = vmatprep.mubr.msk.f32.mxu0 %vm6741_vm12, %v5962_v6  ;;  %vm6744_vm12 = vcmask 261120  }
0x1543   :  { %v3091_v52 = vpop.f32.mrf.mxu0 }
0x1544   :  { %v3171_v54 = vrot.slane %v3091_v52, %v5802_v11 }
0x1545   :  { %v5243_v58 = vpop.f32.mrf.mxu0 }
0x1546   :  { %v3172_v56 = vmul.f32 %v3171_v54, %v2932_v19  ;;  %v3173_v9 = vmul.f32 %v3171_v54, %v2933_v20  ;;  %v3336_v19 = vld [vmem:[%s6611_s18] sm:$0xff] }
0x1547   :  { %v3164_v59 = vpop.f32.mrf.mxu0  ;;  %v4668_v20 = vld [vmem:[%s6611_s18 + $0x40] sm:$0xff] }
0x1548   :  { %v3177_v57 = vrot.slane %v3164_v59, %v5802_v11 }
0x1549   :  { %v5248_v8 = vpop.f32.mrf.mxu0 }
0x154a   :  { %v3178_v62 = vadd.f32 %v3177_v57, %v3172_v56  ;;  %v3179_v63 = vadd.f32 %v3177_v57, %v3173_v9 }
0x154c   :  { %vm3181_vm9 = vcmp.gt.f32.partialorder %v3179_v63, 0.0  ;;  %v3182_v1 = vmul.f32 0.1, %v3178_v62  ;;  %v3183_v2 = vmul.f32 0.1, %v3179_v63  ;;  %vm3180_vm10 = vcmp.gt.f32.partialorder %v3178_v62, 0.0 }
0x154e   :  { %v3185_v3 = vsel %vm3181_vm9, %v3179_v63, %v3183_v2  ;;  %v3184_v6 = vsel %vm3180_vm10, %v3178_v62, %v3182_v1  ;;  %vm6745_vm9 = vmmov %vm6744_vm12 }
0x154f   :  { %5249 = vmatprep.subr.mxu1 %v3185_v3  ;;  %5256 = vmatprep.subr.mxu0 %v3185_v3  ;;  %vm6746_vm10 = vmmov %vm6745_vm9 }
0x1550   :  { %5250 = vmatpush3.msra.mxu1 %v3185_v3  ;;  %5257 = vmatpush3.msra.mxu0 %v3185_v3 }
0x1551   :  { %5251 = vmatprep.subr.mxu1 %v3184_v6  ;;  %5258 = vmatprep.subr.mxu0 %v3184_v6 }
0x1552   :  { %5252 = vmatpush3.msra.mxu1 %v3184_v6  ;;  %5259 = vmatpush3.msra.mxu0 %v3184_v6 }
0x1553   :  { %5254 = vmatmul.mubr.msk.f32.vlgmr.msra.gmra.mxu1 %vm6742_vm11, %v5973_v26  ;;  %5261 = vmatmul.mubr.msk.f32.vlgmr.msra.gmra.mxu0 %vm6743_vm8, %v5978_v27  ;;  %v4660_v26 = vld [vmem:[%s6611_s18 + $0x20] sm:$0xff]  ;;  %v4671_v27 = vld [vmem:[%s6611_s18 + $0x58] sm:$0xff]  ;;  %vm6747_vm11 = vmmov %vm6745_vm9 }
0x1554   :  { %5263 = vmatprep.subr.mxu1 %v4663_v4  ;;  %5271 = vmatprep.mubr.msk.f32.mxu1 %vm6744_vm12, %v3184_v6  ;;  %vm6748_vm8 = vmmov %vm6745_vm9 }
0x1555   :  { %5264 = vmatpush3.msra.mxu1 %v4663_v4  ;;  %5274 = vmatprep.subr.mxu0 %v3339_v10  ;;  %vm6749_vm12 = vmmov %vm6748_vm8 }
0x1556   :  { %5265 = vmatprep.subr.mxu1 %v4662_v12  ;;  %5275 = vmatpush3.msra.mxu0 %v3339_v10 }
0x1557   :  { %5266 = vmatpush3.msra.mxu1 %v4662_v12  ;;  %5276 = vmatprep.subr.mxu0 %v3338_v13 }
0x1558   :  { %5267 = vmatprep.subr.mxu1 %v4661_v47  ;;  %5277 = vmatpush3.msra.mxu0 %v3338_v13 }
0x1559   :  { %5268 = vmatpush3.msra.mxu1 %v4661_v47  ;;  %5278 = vmatprep.subr.mxu0 %v3337_v17 }
0x155a   :  { %5269 = vmatprep.subr.mxu1 %v4660_v26  ;;  %5279 = vmatpush3.msra.mxu0 %v3337_v17 }
0x155b   :  { %5270 = vmatpush3.msra.mxu1 %v4660_v26  ;;  %5280 = vmatprep.subr.mxu0 %v3336_v19 }
0x155c   :  { %5272 = vmatmul.mubr.msk.f32.vlgmr.msra.gmra.mxu1 %vm6745_vm9, %v3185_v3  ;;  %5285 = vmatprep.subr.mxu1 %v4671_v27  ;;  %vm6750_vm9 = vcmask 1043456  }
0x155d   :  { %5286 = vmatpush3.msra.mxu1 %v4671_v27  ;;  %5281 = vmatpush3.msra.mxu0 %v3336_v19 }
0x155e   :  { %5287 = vmatprep.subr.mxu1 %v4670_v16  ;;  %5296 = vmatprep.subr.mxu0 %v5414_v0 }
0x155f   :  { %5288 = vmatpush3.msra.mxu1 %v4670_v16 }
0x1560   :  { %5289 = vmatprep.subr.mxu1 %v4669_v18 }
0x1561   :  { %5290 = vmatpush3.msra.mxu1 %v4669_v18  ;;  %v3595_v18 = vld [vmem:[%s6612_s19] sm:$0x1] }
0x1562   :  { %5291 = vmatprep.subr.mxu1 %v4668_v20 }
0x1563   :  { %5292 = vmatpush3.msra.mxu1 %v4668_v20 }
0x1564   :  { %5307 = vmatprep.subr.mxu1 %v5414_v0 }
0x1613   :  { %v5255_v21 = vpop.f32.mrf.mxu1  ;;  %v5262_v22 = vpop.f32.mrf.mxu0 }
0x1615   :  { %v3252_v23 = vpop.f32.mrf.mxu1  ;;  %v3327_v24 = vpop.f32.mrf.mxu0 }
0x1616   :  { %5282 = vmatprep.mubr.msk.f32.mxu0 %vm6746_vm10, %v3252_v23  ;;  %5293 = vmatprep.mubr.msk.f32.mxu1 %vm6747_vm11, %v3327_v24  ;;  %vm6751_vm10 = vmmov %vm6748_vm8  ;;  %v4012_v23 = vld [vmem:[%s6614_s21 + $0x8] sm:$0xff]  ;;  %v4011_v24 = vld [vmem:[%s6614_s21] sm:$0xff] }
0x1617   :  { %5283 = vmatmul.mubr.msk.f32.vlgmr.msra.gmra.mxu0 %vm6748_vm8, %v5255_v21  ;;  %5294 = vmatmul.mubr.msk.f32.vlgmr.msra.gmra.mxu1 %vm6749_vm12, %v5262_v22  ;;  %vm6752_vm11 = vmmov %vm6748_vm8  ;;  %v3596_v21 = vld [vmem:[%s6613_s20] sm:$0x1]  ;;  %v4013_v22 = vld [vmem:[%s6614_s21 + $0x10] sm:$0xff] }
0x1618   :  { %5297 = vmatpush3.msk.msra.mxu0 %vm6723_vm7, %v5415_v38  ;;  %5304 = vmatprep.mubr.msk.f32.mxu0 %vm6693_vm0, %v5414_v0  ;;  %vm6754_vm12 = vmmov %vm6750_vm9 }
0x1619   :  { %5298 = vmatprep.subr.mxu0 %v5414_v0  ;;  %5308 = vmatpush3.msk.msra.mxu1 %vm6750_vm9, %v5912_v28 }
0x161a   :  { %5299 = vmatpush3.msk.msra.mxu0 %vm6724_vm13, %v5415_v38  ;;  %5309 = vmatprep.mubr.msk.f32.mxu1 %vm6693_vm0, %v5414_v0 }
0x161b   :  { %5300 = vmatprep.subr.mxu0 %v5414_v0  ;;  %5323 = vmatprep.subr.mxu1 %v5414_v0 }
0x161c   :  { %5301 = vmatpush3.msk.msra.mxu0 %vm6725_vm14, %v5415_v38  ;;  %v5273_v25 = vpop.f32.mrf.mxu1 }
0x161d   :  { %5302 = vmatprep.subr.mxu0 %v5414_v0 }
0x161e   :  { %5303 = vmatpush3.msk.msra.mxu0 %vm6726_vm15, %v5415_v38  ;;  %v3417_v29 = vpop.f32.mrf.mxu1 }
0x161f   :  { %5312 = vmatprep.subr.mxu0 %v5414_v0 }
0x16d7   :  { %v5284_v31 = vpop.f32.mrf.mxu0  ;;  %v5295_v32 = vpop.f32.mrf.mxu1 }
0x16d8   :  { %v3504_v30 = vadd.f32 %v5284_v31, %v5273_v25 }
0x16d9   :  { %v3498_v33 = vpop.f32.mrf.mxu0  ;;  %v3584_v37 = vpop.f32.mrf.mxu1 }
0x16da   :  { %v3594_v34 = vadd.f32 %v5295_v32, %v3504_v30  ;;  %v3499_v36 = vadd.f32 %v3498_v33, %v3417_v29 }
0x16dc   :  { %v3593_v40 = vadd.f32 %v3584_v37, %v3499_v36  ;;  %v3598_v41 = vsel %vm6751_vm10, %v3594_v34, 0.0  ;;  %vm6759_vm10 = vmmov %vm6754_vm12 }
0x16de   :  { %v3597_v43 = vsel %vm6752_vm11, %v3593_v40, 0.0 }
0x16df   :  { %v3599_v46 = vadd.f32 %v3598_v41, %v3597_v43 }
0x16e1   :  { %v3600_v49 = vrot.slane %v3599_v46, 4 }
0x16e3   :  { %v3601_v5 = vadd.f32 %v3600_v49, %v3599_v46 }
0x16e5   :  { %v3602_v52 = vrot.slane %v3601_v5, 2 }
0x16e7   :  { %v3603_v54 = vadd.f32 %v3602_v52, %v3601_v5 }
0x16e9   :  { %v3604_v58 = vrot.slane %v3603_v54, 1 }
0x16eb   :  { %v3605_v59 = vadd.f32 %v3604_v58, %v3603_v54 }
0x16ed   :  { %5305 = vmatmul.mubr.msk.f32.vlgmr.msra.gmra.mxu0 %vm6748_vm8, %v3605_v59 }
0x16ee   :  { %5313 = vmatpush3.msk.msra.mxu0 %vm6723_vm7, %v5415_v38  ;;  %5320 = vmatprep.mubr.msk.f32.mxu0 %vm6693_vm0, %v5414_v0  ;;  %vm6753_vm7 = vcmask 31744  }
0x16ef   :  { %5314 = vmatprep.subr.mxu0 %v5414_v0  ;;  %vm6758_vm9 = vmmov %vm6753_vm7 }
0x16f0   :  { %5315 = vmatpush3.msk.msra.mxu0 %vm6724_vm13, %v5415_v38  ;;  %vm6755_vm13 = vmmov %vm6748_vm8 }
0x16f1   :  { %5316 = vmatprep.subr.mxu0 %v5414_v0  ;;  %vm6760_vm11 = vmmov %vm6753_vm7 }
0x16f2   :  { %5317 = vmatpush3.msk.msra.mxu0 %vm6725_vm14, %v5415_v38  ;;  %vm6756_vm14 = vmmov %vm6748_vm8 }
0x16f3   :  { %5318 = vmatprep.subr.mxu0 %v5414_v0 }
0x16f4   :  { %5319 = vmatpush3.msk.msra.mxu0 %vm6726_vm15, %v5415_v38  ;;  %vm6757_vm15 = vmmov %vm6748_vm8  ;;  %vm6761_vm8 = vnez %v6672_v53 }
0x17ad   :  { %v3675_v14 = vpop.f32.mrf.mxu0 }
0x17ae   :  { %v3679_v56 = vmul.f32 0.0078125, %v3675_v14 }
0x17af   :  { %v5306_v9 = vpop.f32.mrf.mxu0 }
0x17b0   :  { %5310 = vmatmul.mubr.msk.f32.vlgmr.msra.gmra.mxu1 %vm6753_vm7, %v3679_v56  ;;  %vm6762_vm7 = vnez %v6674_v55 }
0x17b1   :  { %5324 = vmatpush3.msk.msra.mxu1 %vm6754_vm12, %v5912_v28  ;;  %5325 = vmatprep.mubr.msk.f32.mxu1 %vm6693_vm0, %v5414_v0 }
0x17b2   :  { %5328 = vmatprep.subr.mxu1 %v5414_v0 }
0x1870   :  { %v3749_v15 = vpop.f32.mrf.mxu1 }
0x1871   :  { %v3756_v44 = vrot.slane %v3749_v15, %v5802_v11 }
0x1872   :  { %v5311_v57 = vpop.f32.mrf.mxu1 }
0x1873   :  { %v6438_v8 = vsub.f32 %v3593_v40, %v3756_v44  ;;  %v6440_v50 = vsub.f32 %v3594_v34, %v3756_v44 }
0x1875   :  { %v3759_v62 = vmul.f32 %v6438_v8, %v6438_v8  ;;  %v3760_v63 = vmul.f32 %v6440_v50, %v6440_v50 }
0x1877   :  { %v3761_v1 = vsel %vm6755_vm13, %v3759_v62, 0.0  ;;  %v3762_v2 = vsel %vm6756_vm14, %v3760_v63, 0.0 }
0x1878   :  { %v3763_v3 = vadd.f32 %v3762_v2, %v3761_v1 }
0x187a   :  { %v3764_v6 = vrot.slane %v3763_v3, 4 }
0x187c   :  { %v3765_v4 = vadd.f32 %v3764_v6, %v3763_v3 }
0x187e   :  { %v3766_v10 = vrot.slane %v3765_v4, 2 }
0x1880   :  { %v3767_v12 = vadd.f32 %v3766_v10, %v3765_v4 }
0x1882   :  { %v3768_v13 = vrot.slane %v3767_v12, 1 }
0x1884   :  { %v3769_v47 = vadd.f32 %v3768_v13, %v3767_v12 }
0x1886   :  { %5321 = vmatmul.mubr.msk.f32.vlgmr.msra.gmra.mxu0 %vm6757_vm15, %v3769_v47  ;;  %vm6763_vm15 = vmmov %vm6756_vm14 }
0x1946   :  { %v3839_v26 = vpop.f32.mrf.mxu0 }
0x1947   :  { %v3843_v27 = vmul.f32 0.0078125, %v3839_v26 }
0x1948   :  { %v5322_v16 = vpop.f32.mrf.mxu0 }
0x1949   :  { %v3844_v17 = vadd.f32 1e-05, %v3843_v27  ;;  %v4096_v16 = vld [vmem:[%s6615_s22] sm:$0x1] }
0x194b   :  { %5410 = vrsqrt.f32 %v3844_v17 }
0x1958   :  { %v5411_v19 = vpop.eup %5410 }
0x1959   :  { %v3846_v20 = vmul.f32 %v5411_v19, %v3595_v18  ;;  %v4097_v19 = vld [vmem:[%s6616_s23] sm:$0x1] }
0x195b   :  { %5326 = vmatmul.mubr.msk.f32.vlgmr.msra.gmra.mxu1 %vm6758_vm9, %v3846_v20  ;;  %vm6764_vm9 = vnez %v6676_v7 }
0x195c   :  { %5329 = vmatpush3.msk.msra.mxu1 %vm6759_vm10, %v5912_v28  ;;  %5330 = vmatprep.mubr.msk.f32.mxu1 %vm6693_vm0, %v5414_v0  ;;  %v4014_v28 = vld [vmem:[%s6614_s21 + $0x18] sm:$0xff]  ;;  %vm6765_vm10 = vcmask 523264  }
0x195d   :  { %5344 = vmatprep.subr.mxu1 %v5414_v0  ;;  %5333 = vmatprep.subr.mxu0 %v4014_v28 }
0x195e   :  { %5334 = vmatpush3.msra.mxu0 %v4014_v28 }
0x195f   :  { %5331 = vmatmul.mubr.msk.f32.vlgmr.msra.gmra.mxu1 %vm6760_vm11, %v3596_v21  ;;  %5335 = vmatprep.subr.mxu0 %v4013_v22  ;;  %vm6766_vm11 = vmmov %vm6765_vm10 }
0x1960   :  { %5345 = vmatpush3.msk.msra.mxu1 %vm5661_vm1, %v5415_v38  ;;  %5360 = vmatprep.mubr.msk.f32.mxu1 %vm6693_vm0, %v5414_v0 }
0x1961   :  { %5346 = vmatprep.subr.mxu1 %v5414_v0  ;;  %5336 = vmatpush3.msra.mxu0 %v4013_v22 }
0x1962   :  { %5347 = vmatpush3.msk.msra.mxu1 %vm5671_vm2, %v5415_v38  ;;  %5337 = vmatprep.subr.mxu0 %v4012_v23 }
0x1963   :  { %5348 = vmatprep.subr.mxu1 %v5414_v0  ;;  %5338 = vmatpush3.msra.mxu0 %v4012_v23 }
0x1964   :  { %5349 = vmatpush3.msk.msra.mxu1 %vm5681_vm3, %v5415_v38  ;;  %5339 = vmatprep.subr.mxu0 %v4011_v24 }
0x1965   :  { %5350 = vmatprep.subr.mxu1 %v5414_v0  ;;  %5340 = vmatpush3.msra.mxu0 %v4011_v24 }
0x1966   :  { %5351 = vmatpush3.msk.msra.mxu1 %vm5693_vm4, %v5415_v38  ;;  %5363 = vmatprep.subr.mxu0 %v5414_v0 }
0x1967   :  { %5352 = vmatprep.subr.mxu1 %v5414_v0 }
0x1968   :  { %5353 = vmatpush3.msk.msra.mxu1 %vm5706_vm5, %v5415_v38 }
0x1969   :  { %5354 = vmatprep.subr.mxu1 %v5414_v0 }
0x196a   :  { %5355 = vmatpush3.msk.msra.mxu1 %vm5719_vm6, %v5415_v38 }
0x196b   :  { %5356 = vmatprep.subr.mxu1 %v5414_v0 }
0x196c   :  { %5357 = vmatpush3.msk.msra.mxu1 %vm6761_vm8, %v5415_v38 }
0x196d   :  { %5358 = vmatprep.subr.mxu1 %v5414_v0 }
0x196e   :  { %5359 = vmatpush3.msk.msra.mxu1 %vm6762_vm7, %v5415_v38 }
0x196f   :  { %5387 = vmatprep.subr.mxu1 %v5414_v0 }
0x1a1b   :  { %v3916_v25 = vpop.f32.mrf.mxu1 }
0x1a1c   :  { %v3996_v29 = vrot.slane %v3916_v25, %v5802_v11 }
0x1a1d   :  { %v5327_v31 = vpop.f32.mrf.mxu1 }
0x1a1e   :  { %v3997_v30 = vmul.f32 %v3996_v29, %v6438_v8  ;;  %v3998_v33 = vmul.f32 %v3996_v29, %v6440_v50 }
0x1a1f   :  { %v3989_v32 = vpop.f32.mrf.mxu1 }
0x1a20   :  { %v4002_v34 = vrot.slane %v3989_v32, %v5802_v11 }
0x1a21   :  { %v5332_v36 = vpop.f32.mrf.mxu1 }
0x1a22   :  { %v4003_v37 = vadd.f32 %v4002_v34, %v3997_v30  ;;  %v4004_v40 = vadd.f32 %v4002_v34, %v3998_v33 }
0x1a24   :  { %vm4006_vm12 = vcmp.gt.f32.partialorder %v4004_v40, 0.0  ;;  %v4007_v41 = vmul.f32 0.1, %v4003_v37  ;;  %v4008_v43 = vmul.f32 0.1, %v4004_v40  ;;  %vm4005_vm13 = vcmp.gt.f32.partialorder %v4003_v37, 0.0 }
0x1a26   :  { %v4009_v46 = vsel %vm4005_vm13, %v4003_v37, %v4007_v41  ;;  %v4010_v49 = vsel %vm4006_vm12, %v4004_v40, %v4008_v43  ;;  %vm6767_vm12 = vmmov %vm6765_vm10  ;;  %vm6768_vm13 = vcmask 64512  }
0x1a27   :  { %5341 = vmatprep.mubr.msk.f32.mxu0 %vm6756_vm14, %v4009_v46 }
0x1a28   :  { %5342 = vmatmul.mubr.msk.f32.vlgmr.msra.gmra.mxu0 %vm6763_vm15, %v4010_v49 }
0x1a29   :  { %5364 = vmatpush3.msk.msra.mxu0 %vm6764_vm9, %v5415_v38  ;;  %5365 = vmatprep.mubr.msk.f32.mxu0 %vm6693_vm0, %v5414_v0 }
0x1a2a   :  { %5368 = vmatprep.subr.mxu0 %v5414_v0 }
0x1ae8   :  { %v5343_v5 = vpop.f32.mrf.mxu0 }
0x1ae9   :  { %v4099_v54 = vsel %vm6765_vm10, %v5343_v5, 0.0 }
0x1aea   :  { %v4087_v52 = vpop.f32.mrf.mxu0 }
0x1aeb   :  { %v4098_v58 = vsel %vm6766_vm11, %v4087_v52, 0.0 }
0x1aec   :  { %v4100_v59 = vadd.f32 %v4099_v54, %v4098_v58 }
0x1aee   :  { %v4101_v14 = vrot.slane %v4100_v59, 4 }
0x1af0   :  { %v4102_v56 = vadd.f32 %v4101_v14, %v4100_v59 }
0x1af2   :  { %v4103_v9 = vrot.slane %v4102_v56, 2 }
0x1af4   :  { %v4104_v15 = vadd.f32 %v4103_v9, %v4102_v56 }
0x1af6   :  { %v4105_v44 = vrot.slane %v4104_v15, 1 }
0x1af8   :  { %v4106_v57 = vadd.f32 %v4105_v44, %v4104_v15 }
0x1afa   :  { %5361 = vmatmul.mubr.msk.f32.vlgmr.msra.gmra.mxu1 %vm6767_vm12, %v4106_v57 }
0x1afb   :  { %5388 = vmatpush3.msk.msra.mxu1 %vm6764_vm9, %v5415_v38  ;;  %5389 = vmatprep.mubr.msk.f32.mxu1 %vm6693_vm0, %v5414_v0 }
0x1afc   :  { %5392 = vmatprep.subr.mxu1 %v5414_v0 }
0x1bba   :  { %v4176_v8 = vpop.f32.mrf.mxu1 }
0x1bbb   :  { %v4180_v50 = vmul.f32 0.0078125, %v4176_v8 }
0x1bbc   :  { %v5362_v62 = vpop.f32.mrf.mxu1 }
0x1bbd   :  { %5366 = vmatmul.mubr.msk.f32.vlgmr.msra.gmra.mxu0 %vm6768_vm13, %v4180_v50 }
0x1bbe   :  { %5369 = vmatpush3.msk.msra.mxu0 %vm5661_vm1, %v5415_v38  ;;  %5384 = vmatprep.mubr.msk.f32.mxu0 %vm6693_vm0, %v5414_v0  ;;  %vm6769_vm1 = vmmov %vm6765_vm10 }
0x1bbf   :  { %5370 = vmatprep.subr.mxu0 %v5414_v0 }
0x1bc0   :  { %5371 = vmatpush3.msk.msra.mxu0 %vm5671_vm2, %v5415_v38  ;;  %vm6770_vm2 = vmmov %vm6769_vm1 }
0x1bc1   :  { %5372 = vmatprep.subr.mxu0 %v5414_v0 }
0x1bc2   :  { %5373 = vmatpush3.msk.msra.mxu0 %vm5681_vm3, %v5415_v38  ;;  %vm6771_vm3 = vmmov %vm6769_vm1 }
0x1bc3   :  { %5374 = vmatprep.subr.mxu0 %v5414_v0 }
0x1bc4   :  { %5375 = vmatpush3.msk.msra.mxu0 %vm5693_vm4, %v5415_v38  ;;  %vm6772_vm4 = vmmov %vm6768_vm13 }
0x1bc5   :  { %5376 = vmatprep.subr.mxu0 %v5414_v0 }
0x1bc6   :  { %5377 = vmatpush3.msk.msra.mxu0 %vm5706_vm5, %v5415_v38  ;;  %vm6773_vm5 = vmmov %vm6772_vm4 }
0x1bc7   :  { %5378 = vmatprep.subr.mxu0 %v5414_v0 }
0x1bc8   :  { %5379 = vmatpush3.msk.msra.mxu0 %vm5719_vm6, %v5415_v38 }
0x1bc9   :  { %5380 = vmatprep.subr.mxu0 %v5414_v0 }
0x1bca   :  { %5381 = vmatpush3.msk.msra.mxu0 %vm6761_vm8, %v5415_v38  ;;  %vm6774_vm8 = vmmov %vm6769_vm1 }
0x1bcb   :  { %5382 = vmatprep.subr.mxu0 %v5414_v0 }
0x1bcc   :  { %5383 = vmatpush3.msk.msra.mxu0 %vm6762_vm7, %v5415_v38  ;;  %vm6775_vm7 = vmmov %vm6769_vm1 }
0x1c7d   :  { %v4250_v35 = vpop.f32.mrf.mxu0 }
0x1c7e   :  { %v4257_v39 = vrot.slane %v4250_v35, %v5802_v11 }
0x1c7f   :  { %v5367_v42 = vpop.f32.mrf.mxu0 }
0x1c80   :  { %v4258_v45 = vsub.f32 %v4087_v52, %v4257_v39  ;;  %v4259_v48 = vsub.f32 %v5343_v5, %v4257_v39 }
0x1c82   :  { %v4260_v51 = vmul.f32 %v4258_v45, %v4258_v45  ;;  %v4261_v63 = vmul.f32 %v4259_v48, %v4259_v48 }
0x1c84   :  { %v4262_v1 = vsel %vm6769_vm1, %v4260_v51, 0.0  ;;  %v4263_v2 = vsel %vm6770_vm2, %v4261_v63, 0.0 }
0x1c85   :  { %v4264_v53 = vadd.f32 %v4263_v2, %v4262_v1 }
0x1c87   :  { %v4265_v3 = vrot.slane %v4264_v53, 4 }
0x1c89   :  { %v4266_v6 = vadd.f32 %v4265_v3, %v4264_v53 }
0x1c8b   :  { %v4267_v4 = vrot.slane %v4266_v6, 2 }
0x1c8d   :  { %v4268_v10 = vadd.f32 %v4267_v4, %v4266_v6 }
0x1c8f   :  { %v4269_v12 = vrot.slane %v4268_v10, 1 }
0x1c91   :  { %v4270_v55 = vadd.f32 %v4269_v12, %v4268_v10 }
0x1c93   :  { %5385 = vmatmul.mubr.msk.f32.vlgmr.msra.gmra.mxu0 %vm6771_vm3, %v4270_v55 }
0x1d53   :  { %v4340_v13 = vpop.f32.mrf.mxu0 }
0x1d54   :  { %v4344_v47 = vmul.f32 0.0078125, %v4340_v13 }
0x1d55   :  { %v5386_v26 = vpop.f32.mrf.mxu0 }
0x1d56   :  { %v4345_v27 = vadd.f32 1e-05, %v4344_v47 }
0x1d58   :  { %5412 = vrsqrt.f32 %v4345_v27 }
0x1d65   :  { %v5413_v17 = vpop.eup %5412 }
0x1d66   :  { %v4347_v18 = vmul.f32 %v5413_v17, %v4096_v16 }
0x1d68   :  { %5390 = vmatmul.mubr.msk.f32.vlgmr.msra.gmra.mxu1 %vm6772_vm4, %v4347_v18 }
0x1d69   :  { %5393 = vmatpush3.msk.msra.mxu1 %vm6764_vm9, %v5415_v38  ;;  %5394 = vmatprep.mubr.msk.f32.mxu1 %vm6693_vm0, %v5414_v0 }
0x1d6c   :  { %5395 = vmatmul.mubr.msk.f32.vlgmr.msra.gmra.mxu1 %vm6773_vm5, %v4097_v19 }
0x1e28   :  { %v4417_v20 = vpop.f32.mrf.mxu1 }
0x1e29   :  { %v4497_v21 = vrot.slane %v4417_v20, %v5802_v11 }
0x1e2a   :  { %v5391_v28 = vpop.f32.mrf.mxu1 }
0x1e2b   :  { %v4498_v23 = vmul.f32 %v4497_v21, %v4258_v45  ;;  %v4499_v24 = vmul.f32 %v4497_v21, %v4259_v48 }
0x1e2c   :  { %v4490_v22 = vpop.f32.mrf.mxu1 }
0x1e2d   :  { %v4503_v25 = vrot.slane %v4490_v22, %v5802_v11 }
0x1e2e   :  { %v5396_v7 = vpop.f32.mrf.mxu1 }
0x1e2f   :  { %v4504_v38 = vadd.f32 %v4503_v25, %v4498_v23  ;;  %v4505_v29 = vadd.f32 %v4503_v25, %v4499_v24 }
0x1e31   :  { %vm4506_vm6 = vcmp.gt.f32.partialorder %v4504_v38, 0.0  ;;  %vm4507_vm0 = vcmp.gt.f32.partialorder %v4505_v29, 0.0  ;;  %v4508_v0 = vmul.f32 0.1, %v4504_v38  ;;  %v4509_v31 = vmul.f32 0.1, %v4505_v29 }
0x1e33   :  { %v4510_v32 = vsel %vm4506_vm6, %v4504_v38, %v4508_v0  ;;  %v4511_v30 = vsel %vm4507_vm0, %v4505_v29, %v4509_v31 }
0x1e34   :  { %v4512_v33 = vadd.f32 %v4510_v32, %v6281_v61  ;;  %v4513_v34 = vadd.f32 %v4511_v30, %v6278_v60 }
0x1e36   :  { %4514 = vst.msk [vmem:[%s6617_s24] sm:$0xff] %vm6774_vm8, %v4512_v33 }
0x1e37   :  { %4515 = vst.msk [vmem:[%s6617_s24 + $0x8] sm:$0xff] %vm6775_vm7, %v4513_v34 }

</bundles_post_ra>
